<compile_context>
chip_gen: v7x
topology: tpu7x:2x2x1
jax: 0.10.0
libtpu: 0.0.40
codegen_flags: <defaults>
</compile_context>

<pallas_src>
import math
import jax
import jax.numpy as jnp
from jax.experimental import pallas as pl
from jax.experimental.pallas import tpu as pltpu

# ---- model dims (small, consistent with the module) ----
VOB_SIZE = 50
D_MODEL = 32          # emb_size == d_model == layer.size
N_HEADS = 4
D_FF = 64
N_LAYERS = 1
EPS = 1e-6
B, S = 2, 8

# packed-weight slab row offsets
_OFF_W2 = 2 * D_MODEL * N_LAYERS          # start of the w2 section
_OFF_V = _OFF_W2 + D_FF * N_LAYERS        # start of the bias/LN section
_W_ROWS = _OFF_V + 4 * N_LAYERS + 1       # total rows (incl. final-norm row)


def _layernorm_torch(x, a, b, eps=EPS):
    """Exactly the module's LayerNorm: mean over last dim, *unbiased* std, eps added to std.
    One exact reciprocal per row + multiply instead of a broadcast divide."""
    d = x.shape[-1]
    mean = jnp.mean(x, axis=-1, keepdims=True)
    xm = x - mean
    var = jnp.sum(xm * xm, axis=-1, keepdims=True) * (1.0 / (d - 1))
    inv = 1.0 / (jnp.sqrt(var) + eps)
    return a * (xm * inv) + b


# ----------------------------- fused Pallas kernel -----------------------------

def encoder_kernel(tok_ref, mask_ref, emb_ref, w_ref, out_ref, x_scratch):
    """Embedding gather + all encoder layers + final LayerNorm in one invocation.

    tok_ref   : SMEM (B*S,) int32      token ids
    mask_ref  : VMEM (B, 1, S) f32     0.0 == masked-out key position
    emb_ref   : VMEM (VOB, 1, D) f32   embedding table (leading-dim indexable)
    w_ref     : VMEM (_W_ROWS, 3D) f32 packed weights / biases / LN params
    out_ref   : VMEM (B*S, D) f32
    x_scratch : VMEM (B*S, D) f32      gather landing buffer
    """
    D, H, DF = D_MODEL, N_HEADS, D_FF
    dk = D // H
    BS = out_ref.shape[0]
    Bn, _, Sn = mask_ref.shape

    # ---- in-kernel embedding gather: 16 unrolled dynamic row reads ----
    for i in range(BS):
        t = tok_ref[i]                                  # scalar token id from SMEM
        x_scratch[i:i + 1, :] = emb_ref[t]              # (1, D) dynamic leading-dim read
    x = x_scratch[...]                                  # (B*S, D)

    # ---- mask -> additive bias, computed once for the whole kernel ----
    bias = jnp.where(mask_ref[...] == 0.0, -1e9, 0.0)   # (B, 1, S)

    for l in range(N_LAYERS):                           # static unroll (N_LAYERS is tiny)
        base = 2 * D * l
        r = _OFF_V + 4 * l
        # only this layer's rows are loaded (ref row-slices, full lane width)
        w1blk = w_ref[base:base + 2 * D, :]                               # (2D, 3D)
        w2blk = w_ref[_OFF_W2 + DF * l:_OFF_W2 + DF * (l + 1), :]         # (DF, 3D)
        vblk = w_ref[r:r + 4, :]                                          # (4, 3D)

        wqkv = w1blk[0:D, :]                    # (D, 3D)  [wq*inv_sqrt_dk | wk | wv]
        wo   = w1blk[D:2 * D, 0:D]              # (D, D)
        wff1 = w1blk[D:2 * D, D:3 * D]          # (D, DF)
        wff2 = w2blk[:, 0:D]                    # (DF, D)

        bqkv = vblk[0:1, :]                     # (1, 3D)  [bq*inv_sqrt_dk | bk | bv]
        bo   = vblk[1:2, 0:D]
        ln1a = vblk[1:2, D:2 * D]
        ln1b = vblk[1:2, 2 * D:3 * D]
        b1   = vblk[2:3, 0:DF]
        b2   = vblk[2:3, DF:DF + D]
        ln2a = vblk[3:4, 0:D]
        ln2b = vblk[3:4, D:2 * D]

        # ---- sublayer 1: x + self_attn(LN1(x)) ----
        xn = _layernorm_torch(x, ln1a, ln1b)
        qkv = jnp.dot(xn, wqkv, preferred_element_type=jnp.float32) + bqkv   # (B*S, 3D)
        q = qkv[:, 0:D].reshape(Bn, Sn, D)       # leading-dim split only
        k = qkv[:, D:2 * D].reshape(Bn, Sn, D)
        v = qkv[:, 2 * D:3 * D].reshape(Bn, Sn, D)

        # per-head score matmuls (scale folded into wq/bq), ONE softmax across all heads
        scores = jnp.stack(
            [jnp.einsum('bqd,bkd->bqk',
                        q[..., h * dk:(h + 1) * dk], k[..., h * dk:(h + 1) * dk],
                        preferred_element_type=jnp.float32)
             for h in range(H)], axis=0)                         # (H, B, S, S)
        scores = scores + bias                                   # single masked-add
        scores = scores - jnp.max(scores, axis=-1, keepdims=True)
        p = jnp.exp(scores)
        p = p * (1.0 / jnp.sum(p, axis=-1, keepdims=True))       # exact reciprocal

        heads = [jnp.einsum('bqk,bkd->bqd', p[h], v[..., h * dk:(h + 1) * dk],
                            preferred_element_type=jnp.float32)
                 for h in range(H)]
        attn = jnp.concatenate(heads, axis=-1).reshape(BS, D)
        attn = jnp.dot(attn, wo, preferred_element_type=jnp.float32) + bo
        x = x + attn                                             # dropout == identity at eval

        # ---- sublayer 2: x + FFN(LN2(x)) ----
        xn2 = _layernorm_torch(x, ln2a, ln2b)
        hdn = jnp.maximum(jnp.dot(xn2, wff1, preferred_element_type=jnp.float32) + b1, 0.0)
        x = x + jnp.dot(hdn, wff2, preferred_element_type=jnp.float32) + b2

    # ---- fused final LayerNorm ----
    rn = _OFF_V + 4 * N_LAYERS
    nblk = w_ref[rn:rn + 1, :]
    out_ref[...] = _layernorm_torch(x, nblk[:, 0:D], nblk[:, D:2 * D])


# ----------------------------- wrapper / packing ------------------------------

def pack_params(params):
    """Pack all per-layer arrays + final norm into ONE slab; fold 1/sqrt(d_k) into wq/bq.
    Also reshape the embedding table to (VOB, 1, D) for leading-dim dynamic indexing."""
    inv = jnp.float32(1.0 / math.sqrt(D_MODEL // N_HEADS))
    zrow = jnp.zeros((1, D_MODEL), jnp.float32)
    w1_rows, w2_rows, v_rows = [], [], []
    for p in params["layers"]:
        w1_rows.append(jnp.concatenate([p["wq"] * inv, p["wk"], p["wv"]], axis=1))   # (D, 3D)
        w1_rows.append(jnp.concatenate([p["wo"], p["w1"]], axis=1))                  # (D, 3D)
        w2_rows.append(jnp.concatenate(
            [p["w2"], jnp.zeros((D_FF, 2 * D_MODEL), jnp.float32)], axis=1))         # (DF, 3D)
        v_rows.append(jnp.concatenate([p["bq"] * inv, p["bk"], p["bv"]], axis=1))
        v_rows.append(jnp.concatenate([p["bo"], p["ln1a"], p["ln1b"]], axis=1))
        v_rows.append(jnp.concatenate([p["b1"], p["b2"]], axis=1))
        v_rows.append(jnp.concatenate([p["ln2a"], p["ln2b"], zrow], axis=1))
    v_rows.append(jnp.concatenate([params["norm_a"], params["norm_b"], zrow], axis=1))
    W = jnp.concatenate(w1_rows + w2_rows + v_rows, axis=0)     # (_W_ROWS, 3D)
    emb3 = params["emb"].reshape(VOB_SIZE, 1, D_MODEL)
    return emb3, W


@jax.jit
def encoder_forward(tokens, mask, emb3, W):
    Bn, Sn = tokens.shape
    out = pl.pallas_call(
        encoder_kernel,
        out_shape=jax.ShapeDtypeStruct((Bn * Sn, D_MODEL), jnp.float32),
        in_specs=[
            pl.BlockSpec(memory_space=pltpu.MemorySpace.SMEM),   # token ids (scalars)
            pl.BlockSpec(memory_space=pltpu.MemorySpace.VMEM),   # mask
            pl.BlockSpec(memory_space=pltpu.MemorySpace.VMEM),   # embedding table
            pl.BlockSpec(memory_space=pltpu.MemorySpace.VMEM),   # packed weights
        ],
        out_specs=pl.BlockSpec(memory_space=pltpu.MemorySpace.VMEM),
        scratch_shapes=[pltpu.VMEM((Bn * Sn, D_MODEL), jnp.float32)],
        # grid-less: whole problem (<100 KiB) lives in VMEM for one invocation
    )(tokens.reshape(Bn * Sn), mask, emb3, W)
    return out.reshape(Bn, Sn, D_MODEL)          # bitcast reshape under jit


# ----------------------------- reference (plain JAX) -----------------------

def encoder_forward_ref(tokens, mask, params):
    x = jnp.take(params["emb"], tokens, axis=0)
    d_k = D_MODEL // N_HEADS
    for p in params["layers"]:
        xn = _layernorm_torch(x, p["ln1a"][0], p["ln1b"][0])
        q = xn @ p["wq"] + p["bq"][0]
        k = xn @ p["wk"] + p["bk"][0]
        v = xn @ p["wv"] + p["bv"][0]
        outs = []
        for h in range(N_HEADS):
            sl = slice(h * d_k, (h + 1) * d_k)
            sc = jnp.einsum("bqd,bkd->bqk", q[..., sl], k[..., sl]) / math.sqrt(d_k)
            sc = jnp.where(mask == 0.0, -1e9, sc)
            w = jax.nn.softmax(sc, axis=-1)
            outs.append(jnp.einsum("bqk,bkd->bqd", w, v[..., sl]))
        attn = jnp.concatenate(outs, axis=-1) @ p["wo"] + p["bo"][0]
        x = x + attn
        xn2 = _layernorm_torch(x, p["ln2a"][0], p["ln2b"][0])
        ff = jnp.maximum(xn2 @ p["w1"] + p["b1"][0], 0.0) @ p["w2"] + p["b2"][0]
        x = x + ff
    return _layernorm_torch(x, params["norm_a"][0], params["norm_b"][0])


# ----------------------------- param init ----------------------------------

def init_params(key):
    ks = jax.random.split(key, 16)

    def rnd(k, shape, scale=0.02):
        return (scale * jax.random.normal(k, shape)).astype(jnp.float32)

    layer = {
        "wq": rnd(ks[0], (D_MODEL, D_MODEL)), "bq": rnd(ks[1], (1, D_MODEL)),
        "wk": rnd(ks[2], (D_MODEL, D_MODEL)), "bk": rnd(ks[3], (1, D_MODEL)),
        "wv": rnd(ks[4], (D_MODEL, D_MODEL)), "bv": rnd(ks[5], (1, D_MODEL)),
        "wo": rnd(ks[6], (D_MODEL, D_MODEL)), "bo": rnd(ks[7], (1, D_MODEL)),
        "w1": rnd(ks[8], (D_MODEL, D_FF)),    "b1": rnd(ks[9], (1, D_FF)),
        "w2": rnd(ks[10], (D_FF, D_MODEL)),   "b2": rnd(ks[11], (1, D_MODEL)),
        "ln1a": jnp.ones((1, D_MODEL), jnp.float32), "ln1b": jnp.zeros((1, D_MODEL), jnp.float32),
        "ln2a": jnp.ones((1, D_MODEL), jnp.float32), "ln2b": jnp.zeros((1, D_MODEL), jnp.float32),
    }
    return {
        "emb": rnd(ks[12], (VOB_SIZE, D_MODEL), scale=1.0),
        "layers": [layer] * N_LAYERS,
        "norm_a": jnp.ones((1, D_MODEL), jnp.float32),
        "norm_b": jnp.zeros((1, D_MODEL), jnp.float32),
    }


if __name__ == "__main__":
    key = jax.random.PRNGKey(0)
    kp, kt = jax.random.split(key)
    params = init_params(kp)
    emb3, W = pack_params(params)          # one-time weight packing / scale folding

    tokens = jax.random.randint(kt, (B, S), 0, VOB_SIZE, dtype=jnp.int32)
    mask = jnp.ones((B, 1, S), jnp.float32)
    mask = mask.at[1, 0, S - 1].set(0.0)   # exercise the masking path on one batch element

    out = encoder_forward(tokens, mask, emb3, W)
    out = jax.block_until_ready(out)

    ref = encoder_forward_ref(tokens, mask, params)
    assert out.shape == (B, S, D_MODEL)
    assert jnp.allclose(out, ref, atol=2e-4, rtol=2e-4), "mismatch vs JAX reference"
    print("KERNEL_OK")
</pallas_src>

<mosaic_0001>
module attributes {stable_mosaic.version = 11 : i64} {
  func.func @encoder_kernel(%arg0: memref<16xi32, #tpu.memory_space<smem>>, %arg1: memref<2x1x8xf32, #tpu.memory_space<vmem>>, %arg2: memref<50x1x32xf32, #tpu.memory_space<vmem>>, %arg3: memref<133x96xf32, #tpu.memory_space<vmem>>, %arg4: memref<16x32xf32, #tpu.memory_space<vmem>>, %arg5: memref<16x32xf32, #tpu.memory_space<vmem>>) attributes {dimension_semantics = [], scalar_prefetch = 0 : i64, scratch_operands = 1 : i64, tpu.core_type = #tpu.core_type<tc>} {
    %c0 = arith.constant 0 : index
    %0 = memref.load %arg0[%c0] : memref<16xi32, #tpu.memory_space<smem>>
    %1 = arith.index_cast %0 : i32 to index
    %c0_0 = arith.constant 0 : index
    %c0_1 = arith.constant 0 : index
    %2 = vector.load %arg2[%1, %c0_0, %c0_1] : memref<50x1x32xf32, #tpu.memory_space<vmem>>, vector<1x1x32xf32>
    %3 = vector.shape_cast %2 : vector<1x1x32xf32> to vector<1x32xf32>
    %c0_2 = arith.constant 0 : index
    %c0_3 = arith.constant 0 : index
    %4 = vector.load %arg5[%c0_2, %c0_3] : memref<16x32xf32, #tpu.memory_space<vmem>>, vector<1x32xf32>
    tpu.vector_store %arg5[%c0_2, %c0_3], %3 {strides = array<i32>} : memref<16x32xf32, #tpu.memory_space<vmem>>, vector<1x32xf32>,
    %c1 = arith.constant 1 : index
    %5 = memref.load %arg0[%c1] : memref<16xi32, #tpu.memory_space<smem>>
    %6 = arith.index_cast %5 : i32 to index
    %c0_4 = arith.constant 0 : index
    %c0_5 = arith.constant 0 : index
    %7 = vector.load %arg2[%6, %c0_4, %c0_5] : memref<50x1x32xf32, #tpu.memory_space<vmem>>, vector<1x1x32xf32>
    %8 = vector.shape_cast %7 : vector<1x1x32xf32> to vector<1x32xf32>
    %c1_6 = arith.constant 1 : index
    %c0_7 = arith.constant 0 : index
    %9 = vector.load %arg5[%c1_6, %c0_7] : memref<16x32xf32, #tpu.memory_space<vmem>>, vector<1x32xf32>
    tpu.vector_store %arg5[%c1_6, %c0_7], %8 {strides = array<i32>} : memref<16x32xf32, #tpu.memory_space<vmem>>, vector<1x32xf32>,
    %c2 = arith.constant 2 : index
    %10 = memref.load %arg0[%c2] : memref<16xi32, #tpu.memory_space<smem>>
    %11 = arith.index_cast %10 : i32 to index
    %c0_8 = arith.constant 0 : index
    %c0_9 = arith.constant 0 : index
    %12 = vector.load %arg2[%11, %c0_8, %c0_9] : memref<50x1x32xf32, #tpu.memory_space<vmem>>, vector<1x1x32xf32>
    %13 = vector.shape_cast %12 : vector<1x1x32xf32> to vector<1x32xf32>
    %c2_10 = arith.constant 2 : index
    %c0_11 = arith.constant 0 : index
    %14 = vector.load %arg5[%c2_10, %c0_11] : memref<16x32xf32, #tpu.memory_space<vmem>>, vector<1x32xf32>
    tpu.vector_store %arg5[%c2_10, %c0_11], %13 {strides = array<i32>} : memref<16x32xf32, #tpu.memory_space<vmem>>, vector<1x32xf32>,
    %c3 = arith.constant 3 : index
    %15 = memref.load %arg0[%c3] : memref<16xi32, #tpu.memory_space<smem>>
    %16 = arith.index_cast %15 : i32 to index
    %c0_12 = arith.constant 0 : index
    %c0_13 = arith.constant 0 : index
    %17 = vector.load %arg2[%16, %c0_12, %c0_13] : memref<50x1x32xf32, #tpu.memory_space<vmem>>, vector<1x1x32xf32>
    %18 = vector.shape_cast %17 : vector<1x1x32xf32> to vector<1x32xf32>
    %c3_14 = arith.constant 3 : index
    %c0_15 = arith.constant 0 : index
    %19 = vector.load %arg5[%c3_14, %c0_15] : memref<16x32xf32, #tpu.memory_space<vmem>>, vector<1x32xf32>
    tpu.vector_store %arg5[%c3_14, %c0_15], %18 {strides = array<i32>} : memref<16x32xf32, #tpu.memory_space<vmem>>, vector<1x32xf32>,
    %c4 = arith.constant 4 : index
    %20 = memref.load %arg0[%c4] : memref<16xi32, #tpu.memory_space<smem>>
    %21 = arith.index_cast %20 : i32 to index
    %c0_16 = arith.constant 0 : index
    %c0_17 = arith.constant 0 : index
    %22 = vector.load %arg2[%21, %c0_16, %c0_17] : memref<50x1x32xf32, #tpu.memory_space<vmem>>, vector<1x1x32xf32>
    %23 = vector.shape_cast %22 : vector<1x1x32xf32> to vector<1x32xf32>
    %c4_18 = arith.constant 4 : index
    %c0_19 = arith.constant 0 : index
    %24 = vector.load %arg5[%c4_18, %c0_19] : memref<16x32xf32, #tpu.memory_space<vmem>>, vector<1x32xf32>
    tpu.vector_store %arg5[%c4_18, %c0_19], %23 {strides = array<i32>} : memref<16x32xf32, #tpu.memory_space<vmem>>, vector<1x32xf32>,
    %c5 = arith.constant 5 : index
    %25 = memref.load %arg0[%c5] : memref<16xi32, #tpu.memory_space<smem>>
    %26 = arith.index_cast %25 : i32 to index
    %c0_20 = arith.constant 0 : index
    %c0_21 = arith.constant 0 : index
    %27 = vector.load %arg2[%26, %c0_20, %c0_21] : memref<50x1x32xf32, #tpu.memory_space<vmem>>, vector<1x1x32xf32>
    %28 = vector.shape_cast %27 : vector<1x1x32xf32> to vector<1x32xf32>
    %c5_22 = arith.constant 5 : index
    %c0_23 = arith.constant 0 : index
    %29 = vector.load %arg5[%c5_22, %c0_23] : memref<16x32xf32, #tpu.memory_space<vmem>>, vector<1x32xf32>
    tpu.vector_store %arg5[%c5_22, %c0_23], %28 {strides = array<i32>} : memref<16x32xf32, #tpu.memory_space<vmem>>, vector<1x32xf32>,
    %c6 = arith.constant 6 : index
    %30 = memref.load %arg0[%c6] : memref<16xi32, #tpu.memory_space<smem>>
    %31 = arith.index_cast %30 : i32 to index
    %c0_24 = arith.constant 0 : index
    %c0_25 = arith.constant 0 : index
    %32 = vector.load %arg2[%31, %c0_24, %c0_25] : memref<50x1x32xf32, #tpu.memory_space<vmem>>, vector<1x1x32xf32>
    %33 = vector.shape_cast %32 : vector<1x1x32xf32> to vector<1x32xf32>
    %c6_26 = arith.constant 6 : index
    %c0_27 = arith.constant 0 : index
    %34 = vector.load %arg5[%c6_26, %c0_27] : memref<16x32xf32, #tpu.memory_space<vmem>>, vector<1x32xf32>
    tpu.vector_store %arg5[%c6_26, %c0_27], %33 {strides = array<i32>} : memref<16x32xf32, #tpu.memory_space<vmem>>, vector<1x32xf32>,
    %c7 = arith.constant 7 : index
    %35 = memref.load %arg0[%c7] : memref<16xi32, #tpu.memory_space<smem>>
    %36 = arith.index_cast %35 : i32 to index
    %c0_28 = arith.constant 0 : index
    %c0_29 = arith.constant 0 : index
    %37 = vector.load %arg2[%36, %c0_28, %c0_29] : memref<50x1x32xf32, #tpu.memory_space<vmem>>, vector<1x1x32xf32>
    %38 = vector.shape_cast %37 : vector<1x1x32xf32> to vector<1x32xf32>
    %c7_30 = arith.constant 7 : index
    %c0_31 = arith.constant 0 : index
    %39 = vector.load %arg5[%c7_30, %c0_31] : memref<16x32xf32, #tpu.memory_space<vmem>>, vector<1x32xf32>
    tpu.vector_store %arg5[%c7_30, %c0_31], %38 {strides = array<i32>} : memref<16x32xf32, #tpu.memory_space<vmem>>, vector<1x32xf32>,
    %c8 = arith.constant 8 : index
    %40 = memref.load %arg0[%c8] : memref<16xi32, #tpu.memory_space<smem>>
    %41 = arith.index_cast %40 : i32 to index
    %c0_32 = arith.constant 0 : index
    %c0_33 = arith.constant 0 : index
    %42 = vector.load %arg2[%41, %c0_32, %c0_33] : memref<50x1x32xf32, #tpu.memory_space<vmem>>, vector<1x1x32xf32>
    %43 = vector.shape_cast %42 : vector<1x1x32xf32> to vector<1x32xf32>
    %c8_34 = arith.constant 8 : index
    %c0_35 = arith.constant 0 : index
    %44 = vector.load %arg5[%c8_34, %c0_35] : memref<16x32xf32, #tpu.memory_space<vmem>>, vector<1x32xf32>
    tpu.vector_store %arg5[%c8_34, %c0_35], %43 {strides = array<i32>} : memref<16x32xf32, #tpu.memory_space<vmem>>, vector<1x32xf32>,
    %c9 = arith.constant 9 : index
    %45 = memref.load %arg0[%c9] : memref<16xi32, #tpu.memory_space<smem>>
    %46 = arith.index_cast %45 : i32 to index
    %c0_36 = arith.constant 0 : index
    %c0_37 = arith.constant 0 : index
    %47 = vector.load %arg2[%46, %c0_36, %c0_37] : memref<50x1x32xf32, #tpu.memory_space<vmem>>, vector<1x1x32xf32>
    %48 = vector.shape_cast %47 : vector<1x1x32xf32> to vector<1x32xf32>
    %c9_38 = arith.constant 9 : index
    %c0_39 = arith.constant 0 : index
    %49 = vector.load %arg5[%c9_38, %c0_39] : memref<16x32xf32, #tpu.memory_space<vmem>>, vector<1x32xf32>
    tpu.vector_store %arg5[%c9_38, %c0_39], %48 {strides = array<i32>} : memref<16x32xf32, #tpu.memory_space<vmem>>, vector<1x32xf32>,
    %c10 = arith.constant 10 : index
    %50 = memref.load %arg0[%c10] : memref<16xi32, #tpu.memory_space<smem>>
    %51 = arith.index_cast %50 : i32 to index
    %c0_40 = arith.constant 0 : index
    %c0_41 = arith.constant 0 : index
    %52 = vector.load %arg2[%51, %c0_40, %c0_41] : memref<50x1x32xf32, #tpu.memory_space<vmem>>, vector<1x1x32xf32>
    %53 = vector.shape_cast %52 : vector<1x1x32xf32> to vector<1x32xf32>
    %c10_42 = arith.constant 10 : index
    %c0_43 = arith.constant 0 : index
    %54 = vector.load %arg5[%c10_42, %c0_43] : memref<16x32xf32, #tpu.memory_space<vmem>>, vector<1x32xf32>
    tpu.vector_store %arg5[%c10_42, %c0_43], %53 {strides = array<i32>} : memref<16x32xf32, #tpu.memory_space<vmem>>, vector<1x32xf32>,
    %c11 = arith.constant 11 : index
    %55 = memref.load %arg0[%c11] : memref<16xi32, #tpu.memory_space<smem>>
    %56 = arith.index_cast %55 : i32 to index
    %c0_44 = arith.constant 0 : index
    %c0_45 = arith.constant 0 : index
    %57 = vector.load %arg2[%56, %c0_44, %c0_45] : memref<50x1x32xf32, #tpu.memory_space<vmem>>, vector<1x1x32xf32>
    %58 = vector.shape_cast %57 : vector<1x1x32xf32> to vector<1x32xf32>
    %c11_46 = arith.constant 11 : index
    %c0_47 = arith.constant 0 : index
    %59 = vector.load %arg5[%c11_46, %c0_47] : memref<16x32xf32, #tpu.memory_space<vmem>>, vector<1x32xf32>
    tpu.vector_store %arg5[%c11_46, %c0_47], %58 {strides = array<i32>} : memref<16x32xf32, #tpu.memory_space<vmem>>, vector<1x32xf32>,
    %c12 = arith.constant 12 : index
    %60 = memref.load %arg0[%c12] : memref<16xi32, #tpu.memory_space<smem>>
    %61 = arith.index_cast %60 : i32 to index
    %c0_48 = arith.constant 0 : index
    %c0_49 = arith.constant 0 : index
    %62 = vector.load %arg2[%61, %c0_48, %c0_49] : memref<50x1x32xf32, #tpu.memory_space<vmem>>, vector<1x1x32xf32>
    %63 = vector.shape_cast %62 : vector<1x1x32xf32> to vector<1x32xf32>
    %c12_50 = arith.constant 12 : index
    %c0_51 = arith.constant 0 : index
    %64 = vector.load %arg5[%c12_50, %c0_51] : memref<16x32xf32, #tpu.memory_space<vmem>>, vector<1x32xf32>
    tpu.vector_store %arg5[%c12_50, %c0_51], %63 {strides = array<i32>} : memref<16x32xf32, #tpu.memory_space<vmem>>, vector<1x32xf32>,
    %c13 = arith.constant 13 : index
    %65 = memref.load %arg0[%c13] : memref<16xi32, #tpu.memory_space<smem>>
    %66 = arith.index_cast %65 : i32 to index
    %c0_52 = arith.constant 0 : index
    %c0_53 = arith.constant 0 : index
    %67 = vector.load %arg2[%66, %c0_52, %c0_53] : memref<50x1x32xf32, #tpu.memory_space<vmem>>, vector<1x1x32xf32>
    %68 = vector.shape_cast %67 : vector<1x1x32xf32> to vector<1x32xf32>
    %c13_54 = arith.constant 13 : index
    %c0_55 = arith.constant 0 : index
    %69 = vector.load %arg5[%c13_54, %c0_55] : memref<16x32xf32, #tpu.memory_space<vmem>>, vector<1x32xf32>
    tpu.vector_store %arg5[%c13_54, %c0_55], %68 {strides = array<i32>} : memref<16x32xf32, #tpu.memory_space<vmem>>, vector<1x32xf32>,
    %c14 = arith.constant 14 : index
    %70 = memref.load %arg0[%c14] : memref<16xi32, #tpu.memory_space<smem>>
    %71 = arith.index_cast %70 : i32 to index
    %c0_56 = arith.constant 0 : index
    %c0_57 = arith.constant 0 : index
    %72 = vector.load %arg2[%71, %c0_56, %c0_57] : memref<50x1x32xf32, #tpu.memory_space<vmem>>, vector<1x1x32xf32>
    %73 = vector.shape_cast %72 : vector<1x1x32xf32> to vector<1x32xf32>
    %c14_58 = arith.constant 14 : index
    %c0_59 = arith.constant 0 : index
    %74 = vector.load %arg5[%c14_58, %c0_59] : memref<16x32xf32, #tpu.memory_space<vmem>>, vector<1x32xf32>
    tpu.vector_store %arg5[%c14_58, %c0_59], %73 {strides = array<i32>} : memref<16x32xf32, #tpu.memory_space<vmem>>, vector<1x32xf32>,
    %c15 = arith.constant 15 : index
    %75 = memref.load %arg0[%c15] : memref<16xi32, #tpu.memory_space<smem>>
    %76 = arith.index_cast %75 : i32 to index
    %c0_60 = arith.constant 0 : index
    %c0_61 = arith.constant 0 : index
    %77 = vector.load %arg2[%76, %c0_60, %c0_61] : memref<50x1x32xf32, #tpu.memory_space<vmem>>, vector<1x1x32xf32>
    %78 = vector.shape_cast %77 : vector<1x1x32xf32> to vector<1x32xf32>
    %c15_62 = arith.constant 15 : index
    %c0_63 = arith.constant 0 : index
    %79 = vector.load %arg5[%c15_62, %c0_63] : memref<16x32xf32, #tpu.memory_space<vmem>>, vector<1x32xf32>
    tpu.vector_store %arg5[%c15_62, %c0_63], %78 {strides = array<i32>} : memref<16x32xf32, #tpu.memory_space<vmem>>, vector<1x32xf32>,
    %c0_64 = arith.constant 0 : index
    %c0_65 = arith.constant 0 : index
    %80 = vector.load %arg5[%c0_64, %c0_65] : memref<16x32xf32, #tpu.memory_space<vmem>>, vector<16x32xf32>
    %c0_66 = arith.constant 0 : index
    %c0_67 = arith.constant 0 : index
    %c0_68 = arith.constant 0 : index
    %81 = vector.load %arg1[%c0_66, %c0_67, %c0_68] : memref<2x1x8xf32, #tpu.memory_space<vmem>>, vector<2x1x8xf32>
    %cst = arith.constant 0.000000e+00 : f32
    %82 = vector.broadcast %cst : f32 to vector<2x1x8xf32>
    %83 = arith.cmpf oeq, %81, %82 : vector<2x1x8xf32>
    %cst_69 = arith.constant -1.000000e+09 : f32
    %cst_70 = arith.constant 0.000000e+00 : f32
    %84 = vector.broadcast %cst_69 : f32 to vector<2x1x8xf32>
    %85 = vector.broadcast %cst_70 : f32 to vector<2x1x8xf32>
    %86 = arith.select %83, %84, %85 : vector<2x1x8xi1>, vector<2x1x8xf32>
    %c0_71 = arith.constant 0 : index
    %c0_72 = arith.constant 0 : index
    %87 = vector.load %arg3[%c0_71, %c0_72] : memref<133x96xf32, #tpu.memory_space<vmem>>, vector<64x96xf32>
    %c64 = arith.constant 64 : index
    %c0_73 = arith.constant 0 : index
    %88 = vector.load %arg3[%c64, %c0_73] : memref<133x96xf32, #tpu.memory_space<vmem>>, vector<64x96xf32>
    %c128 = arith.constant 128 : index
    %c0_74 = arith.constant 0 : index
    %89 = vector.load %arg3[%c128, %c0_74] : memref<133x96xf32, #tpu.memory_space<vmem>>, vector<4x96xf32>
    %90 = vector.extract_strided_slice %87 {offsets = [0, 0], sizes = [32, 96], strides = [1, 1]} : vector<64x96xf32> to vector<32x96xf32>
    %91 = vector.extract_strided_slice %87 {offsets = [32, 0], sizes = [32, 32], strides = [1, 1]} : vector<64x96xf32> to vector<32x32xf32>
    %92 = vector.extract_strided_slice %87 {offsets = [32, 32], sizes = [32, 64], strides = [1, 1]} : vector<64x96xf32> to vector<32x64xf32>
    %93 = vector.extract_strided_slice %88 {offsets = [0, 0], sizes = [64, 32], strides = [1, 1]} : vector<64x96xf32> to vector<64x32xf32>
    %94 = vector.extract_strided_slice %89 {offsets = [0, 0], sizes = [1, 96], strides = [1, 1]} : vector<4x96xf32> to vector<1x96xf32>
    %95 = vector.extract_strided_slice %89 {offsets = [1, 0], sizes = [1, 32], strides = [1, 1]} : vector<4x96xf32> to vector<1x32xf32>
    %96 = vector.extract_strided_slice %89 {offsets = [1, 32], sizes = [1, 32], strides = [1, 1]} : vector<4x96xf32> to vector<1x32xf32>
    %97 = vector.extract_strided_slice %89 {offsets = [1, 64], sizes = [1, 32], strides = [1, 1]} : vector<4x96xf32> to vector<1x32xf32>
    %98 = vector.extract_strided_slice %89 {offsets = [2, 0], sizes = [1, 64], strides = [1, 1]} : vector<4x96xf32> to vector<1x64xf32>
    %99 = vector.extract_strided_slice %89 {offsets = [2, 64], sizes = [1, 32], strides = [1, 1]} : vector<4x96xf32> to vector<1x32xf32>
    %100 = vector.extract_strided_slice %89 {offsets = [3, 0], sizes = [1, 32], strides = [1, 1]} : vector<4x96xf32> to vector<1x32xf32>
    %101 = vector.extract_strided_slice %89 {offsets = [3, 32], sizes = [1, 32], strides = [1, 1]} : vector<4x96xf32> to vector<1x32xf32>
    %cst_75 = arith.constant dense<0.000000e+00> : vector<16xf32>
    %102 = vector.multi_reduction <add>, %80, %cst_75 [1] : vector<16x32xf32> to vector<16xf32>
    %103 = vector.shape_cast %102 : vector<16xf32> to vector<16x1xf32>
    %cst_76 = arith.constant 3.200000e+01 : f32
    %104 = vector.broadcast %cst_76 : f32 to vector<16x1xf32>
    %105 = arith.divf %103, %104 : vector<16x1xf32>
    %106 = vector.broadcast %105 : vector<16x1xf32> to vector<16x32xf32>
    %107 = arith.subf %80, %106 : vector<16x32xf32>
    %108 = arith.mulf %107, %107 : vector<16x32xf32>
    %cst_77 = arith.constant dense<0.000000e+00> : vector<16xf32>
    %109 = vector.multi_reduction <add>, %108, %cst_77 [1] : vector<16x32xf32> to vector<16xf32>
    %110 = vector.shape_cast %109 : vector<16xf32> to vector<16x1xf32>
    %cst_78 = arith.constant 0.0322580636 : f32
    %111 = vector.broadcast %cst_78 : f32 to vector<16x1xf32>
    %112 = arith.mulf %110, %111 : vector<16x1xf32>
    %113 = math.sqrt %112 : vector<16x1xf32>
    %cst_79 = arith.constant 9.99999997E-7 : f32
    %114 = vector.broadcast %cst_79 : f32 to vector<16x1xf32>
    %115 = arith.addf %113, %114 : vector<16x1xf32>
    %cst_80 = arith.constant 1.000000e+00 : f32
    %116 = vector.broadcast %cst_80 : f32 to vector<16x1xf32>
    %117 = arith.divf %116, %115 : vector<16x1xf32>
    %118 = vector.broadcast %117 : vector<16x1xf32> to vector<16x32xf32>
    %119 = arith.mulf %107, %118 : vector<16x32xf32>
    %120 = vector.broadcast %96 : vector<1x32xf32> to vector<16x32xf32>
    %121 = arith.mulf %120, %119 : vector<16x32xf32>
    %122 = vector.broadcast %97 : vector<1x32xf32> to vector<16x32xf32>
    %123 = arith.addf %121, %122 : vector<16x32xf32>
    %cst_81 = arith.constant dense<0.000000e+00> : vector<16x96xf32>
    %124 = tpu.matmul %123, %90, %cst_81 {dimension_numbers = #tpu.dot_dimension_numbers<[1], [0], [0], [1], [0, 0, 1, 1], [], []>} : vector<16x32xf32>, vector<32x96xf32>, vector<16x96xf32> -> vector<16x96xf32>
    %125 = vector.broadcast %94 : vector<1x96xf32> to vector<16x96xf32>
    %126 = arith.addf %124, %125 : vector<16x96xf32>
    %127 = vector.extract_strided_slice %126 {offsets = [0, 0], sizes = [16, 32], strides = [1, 1]} : vector<16x96xf32> to vector<16x32xf32>
    %128 = vector.shape_cast %127 : vector<16x32xf32> to vector<2x8x32xf32>
    %129 = vector.extract_strided_slice %126 {offsets = [0, 32], sizes = [16, 32], strides = [1, 1]} : vector<16x96xf32> to vector<16x32xf32>
    %130 = vector.shape_cast %129 : vector<16x32xf32> to vector<2x8x32xf32>
    %131 = vector.extract_strided_slice %126 {offsets = [0, 64], sizes = [16, 32], strides = [1, 1]} : vector<16x96xf32> to vector<16x32xf32>
    %132 = vector.shape_cast %131 : vector<16x32xf32> to vector<2x8x32xf32>
    %133 = vector.extract_strided_slice %128 {offsets = [0, 0, 0], sizes = [2, 8, 8], strides = [1, 1, 1]} : vector<2x8x32xf32> to vector<2x8x8xf32>
    %134 = vector.extract_strided_slice %130 {offsets = [0, 0, 0], sizes = [2, 8, 8], strides = [1, 1, 1]} : vector<2x8x32xf32> to vector<2x8x8xf32>
    "tpu.trace_start"() <{level = 10 : i32, message = "bqd,bkd->bqk"}> : () -> ()
    %cst_82 = arith.constant dense<0.000000e+00> : vector<2x8x8xf32>
    %135 = tpu.matmul %133, %134, %cst_82 {dimension_numbers = #tpu.dot_dimension_numbers<[2], [2], [1], [1], [0, 0, 0, 1, 1, 1], [0], [0]>} : vector<2x8x8xf32>, vector<2x8x8xf32>, vector<2x8x8xf32> -> vector<2x8x8xf32>
    "tpu.trace_stop"() : () -> ()
    %136 = vector.extract_strided_slice %128 {offsets = [0, 0, 8], sizes = [2, 8, 8], strides = [1, 1, 1]} : vector<2x8x32xf32> to vector<2x8x8xf32>
    %137 = vector.extract_strided_slice %130 {offsets = [0, 0, 8], sizes = [2, 8, 8], strides = [1, 1, 1]} : vector<2x8x32xf32> to vector<2x8x8xf32>
    "tpu.trace_start"() <{level = 10 : i32, message = "bqd,bkd->bqk"}> : () -> ()
    %cst_83 = arith.constant dense<0.000000e+00> : vector<2x8x8xf32>
    %138 = tpu.matmul %136, %137, %cst_83 {dimension_numbers = #tpu.dot_dimension_numbers<[2], [2], [1], [1], [0, 0, 0, 1, 1, 1], [0], [0]>} : vector<2x8x8xf32>, vector<2x8x8xf32>, vector<2x8x8xf32> -> vector<2x8x8xf32>
    "tpu.trace_stop"() : () -> ()
    %139 = vector.extract_strided_slice %128 {offsets = [0, 0, 16], sizes = [2, 8, 8], strides = [1, 1, 1]} : vector<2x8x32xf32> to vector<2x8x8xf32>
    %140 = vector.extract_strided_slice %130 {offsets = [0, 0, 16], sizes = [2, 8, 8], strides = [1, 1, 1]} : vector<2x8x32xf32> to vector<2x8x8xf32>
    "tpu.trace_start"() <{level = 10 : i32, message = "bqd,bkd->bqk"}> : () -> ()
    %cst_84 = arith.constant dense<0.000000e+00> : vector<2x8x8xf32>
    %141 = tpu.matmul %139, %140, %cst_84 {dimension_numbers = #tpu.dot_dimension_numbers<[2], [2], [1], [1], [0, 0, 0, 1, 1, 1], [0], [0]>} : vector<2x8x8xf32>, vector<2x8x8xf32>, vector<2x8x8xf32> -> vector<2x8x8xf32>
    "tpu.trace_stop"() : () -> ()
    %142 = vector.extract_strided_slice %128 {offsets = [0, 0, 24], sizes = [2, 8, 8], strides = [1, 1, 1]} : vector<2x8x32xf32> to vector<2x8x8xf32>
    %143 = vector.extract_strided_slice %130 {offsets = [0, 0, 24], sizes = [2, 8, 8], strides = [1, 1, 1]} : vector<2x8x32xf32> to vector<2x8x8xf32>
    "tpu.trace_start"() <{level = 10 : i32, message = "bqd,bkd->bqk"}> : () -> ()
    %cst_85 = arith.constant dense<0.000000e+00> : vector<2x8x8xf32>
    %144 = tpu.matmul %142, %143, %cst_85 {dimension_numbers = #tpu.dot_dimension_numbers<[2], [2], [1], [1], [0, 0, 0, 1, 1, 1], [0], [0]>} : vector<2x8x8xf32>, vector<2x8x8xf32>, vector<2x8x8xf32> -> vector<2x8x8xf32>
    "tpu.trace_stop"() : () -> ()
    %145 = vector.shape_cast %135 : vector<2x8x8xf32> to vector<1x2x8x8xf32>
    %146 = vector.shape_cast %138 : vector<2x8x8xf32> to vector<1x2x8x8xf32>
    %147 = vector.shape_cast %141 : vector<2x8x8xf32> to vector<1x2x8x8xf32>
    %148 = vector.shape_cast %144 : vector<2x8x8xf32> to vector<1x2x8x8xf32>
    %149 = tpu.concatenate %145, %146, %147, %148 in 0 : vector<1x2x8x8xf32>, vector<1x2x8x8xf32>, vector<1x2x8x8xf32>, vector<1x2x8x8xf32> -> vector<4x2x8x8xf32>
    %150 = vector.shape_cast %86 : vector<2x1x8xf32> to vector<1x2x1x8xf32>
    %151 = vector.broadcast %150 : vector<1x2x1x8xf32> to vector<4x2x8x8xf32>
    %152 = arith.addf %149, %151 : vector<4x2x8x8xf32>
    %cst_86 = arith.constant dense<0xFF800000> : vector<4x2x8xf32>
    %153 = vector.multi_reduction <maximumf>, %152, %cst_86 [3] : vector<4x2x8x8xf32> to vector<4x2x8xf32>
    %154 = vector.shape_cast %153 : vector<4x2x8xf32> to vector<4x2x8x1xf32>
    %155 = vector.broadcast %154 : vector<4x2x8x1xf32> to vector<4x2x8x8xf32>
    %156 = arith.subf %152, %155 : vector<4x2x8x8xf32>
    %157 = math.exp %156 : vector<4x2x8x8xf32>
    %cst_87 = arith.constant dense<0.000000e+00> : vector<4x2x8xf32>
    %158 = vector.multi_reduction <add>, %157, %cst_87 [3] : vector<4x2x8x8xf32> to vector<4x2x8xf32>
    %159 = vector.shape_cast %158 : vector<4x2x8xf32> to vector<4x2x8x1xf32>
    %cst_88 = arith.constant 1.000000e+00 : f32
    %160 = vector.broadcast %cst_88 : f32 to vector<4x2x8x1xf32>
    %161 = arith.divf %160, %159 : vector<4x2x8x1xf32>
    %162 = vector.broadcast %161 : vector<4x2x8x1xf32> to vector<4x2x8x8xf32>
    %163 = arith.mulf %157, %162 : vector<4x2x8x8xf32>
    %164 = vector.extract_strided_slice %163 {offsets = [0, 0, 0, 0], sizes = [1, 2, 8, 8], strides = [1, 1, 1, 1]} : vector<4x2x8x8xf32> to vector<1x2x8x8xf32>
    %165 = vector.shape_cast %164 : vector<1x2x8x8xf32> to vector<2x8x8xf32>
    %166 = vector.extract_strided_slice %132 {offsets = [0, 0, 0], sizes = [2, 8, 8], strides = [1, 1, 1]} : vector<2x8x32xf32> to vector<2x8x8xf32>
    "tpu.trace_start"() <{level = 10 : i32, message = "bqk,bkd->bqd"}> : () -> ()
    %cst_89 = arith.constant dense<0.000000e+00> : vector<2x8x8xf32>
    %167 = tpu.matmul %165, %166, %cst_89 {dimension_numbers = #tpu.dot_dimension_numbers<[2], [1], [1], [2], [0, 0, 0, 1, 1, 2], [0], [0]>} : vector<2x8x8xf32>, vector<2x8x8xf32>, vector<2x8x8xf32> -> vector<2x8x8xf32>
    "tpu.trace_stop"() : () -> ()
    %168 = vector.extract_strided_slice %163 {offsets = [1, 0, 0, 0], sizes = [1, 2, 8, 8], strides = [1, 1, 1, 1]} : vector<4x2x8x8xf32> to vector<1x2x8x8xf32>
    %169 = vector.shape_cast %168 : vector<1x2x8x8xf32> to vector<2x8x8xf32>
    %170 = vector.extract_strided_slice %132 {offsets = [0, 0, 8], sizes = [2, 8, 8], strides = [1, 1, 1]} : vector<2x8x32xf32> to vector<2x8x8xf32>
    "tpu.trace_start"() <{level = 10 : i32, message = "bqk,bkd->bqd"}> : () -> ()
    %cst_90 = arith.constant dense<0.000000e+00> : vector<2x8x8xf32>
    %171 = tpu.matmul %169, %170, %cst_90 {dimension_numbers = #tpu.dot_dimension_numbers<[2], [1], [1], [2], [0, 0, 0, 1, 1, 2], [0], [0]>} : vector<2x8x8xf32>, vector<2x8x8xf32>, vector<2x8x8xf32> -> vector<2x8x8xf32>
    "tpu.trace_stop"() : () -> ()
    %172 = vector.extract_strided_slice %163 {offsets = [2, 0, 0, 0], sizes = [1, 2, 8, 8], strides = [1, 1, 1, 1]} : vector<4x2x8x8xf32> to vector<1x2x8x8xf32>
    %173 = vector.shape_cast %172 : vector<1x2x8x8xf32> to vector<2x8x8xf32>
    %174 = vector.extract_strided_slice %132 {offsets = [0, 0, 16], sizes = [2, 8, 8], strides = [1, 1, 1]} : vector<2x8x32xf32> to vector<2x8x8xf32>
    "tpu.trace_start"() <{level = 10 : i32, message = "bqk,bkd->bqd"}> : () -> ()
    %cst_91 = arith.constant dense<0.000000e+00> : vector<2x8x8xf32>
    %175 = tpu.matmul %173, %174, %cst_91 {dimension_numbers = #tpu.dot_dimension_numbers<[2], [1], [1], [2], [0, 0, 0, 1, 1, 2], [0], [0]>} : vector<2x8x8xf32>, vector<2x8x8xf32>, vector<2x8x8xf32> -> vector<2x8x8xf32>
    "tpu.trace_stop"() : () -> ()
    %176 = vector.extract_strided_slice %163 {offsets = [3, 0, 0, 0], sizes = [1, 2, 8, 8], strides = [1, 1, 1, 1]} : vector<4x2x8x8xf32> to vector<1x2x8x8xf32>
    %177 = vector.shape_cast %176 : vector<1x2x8x8xf32> to vector<2x8x8xf32>
    %178 = vector.extract_strided_slice %132 {offsets = [0, 0, 24], sizes = [2, 8, 8], strides = [1, 1, 1]} : vector<2x8x32xf32> to vector<2x8x8xf32>
    "tpu.trace_start"() <{level = 10 : i32, message = "bqk,bkd->bqd"}> : () -> ()
    %cst_92 = arith.constant dense<0.000000e+00> : vector<2x8x8xf32>
    %179 = tpu.matmul %177, %178, %cst_92 {dimension_numbers = #tpu.dot_dimension_numbers<[2], [1], [1], [2], [0, 0, 0, 1, 1, 2], [0], [0]>} : vector<2x8x8xf32>, vector<2x8x8xf32>, vector<2x8x8xf32> -> vector<2x8x8xf32>
    "tpu.trace_stop"() : () -> ()
    %180 = tpu.concatenate %167, %171, %175, %179 in 2 : vector<2x8x8xf32>, vector<2x8x8xf32>, vector<2x8x8xf32>, vector<2x8x8xf32> -> vector<2x8x32xf32>
    %181 = vector.shape_cast %180 : vector<2x8x32xf32> to vector<16x32xf32>
    %cst_93 = arith.constant dense<0.000000e+00> : vector<16x32xf32>
    %182 = tpu.matmul %181, %91, %cst_93 {dimension_numbers = #tpu.dot_dimension_numbers<[1], [0], [0], [1], [0, 0, 1, 1], [], []>} : vector<16x32xf32>, vector<32x32xf32>, vector<16x32xf32> -> vector<16x32xf32>
    %183 = vector.broadcast %95 : vector<1x32xf32> to vector<16x32xf32>
    %184 = arith.addf %182, %183 : vector<16x32xf32>
    %185 = arith.addf %80, %184 : vector<16x32xf32>
    %cst_94 = arith.constant dense<0.000000e+00> : vector<16xf32>
    %186 = vector.multi_reduction <add>, %185, %cst_94 [1] : vector<16x32xf32> to vector<16xf32>
    %187 = vector.shape_cast %186 : vector<16xf32> to vector<16x1xf32>
    %cst_95 = arith.constant 3.200000e+01 : f32
    %188 = vector.broadcast %cst_95 : f32 to vector<16x1xf32>
    %189 = arith.divf %187, %188 : vector<16x1xf32>
    %190 = vector.broadcast %189 : vector<16x1xf32> to vector<16x32xf32>
    %191 = arith.subf %185, %190 : vector<16x32xf32>
    %192 = arith.mulf %191, %191 : vector<16x32xf32>
    %cst_96 = arith.constant dense<0.000000e+00> : vector<16xf32>
    %193 = vector.multi_reduction <add>, %192, %cst_96 [1] : vector<16x32xf32> to vector<16xf32>
    %194 = vector.shape_cast %193 : vector<16xf32> to vector<16x1xf32>
    %cst_97 = arith.constant 0.0322580636 : f32
    %195 = vector.broadcast %cst_97 : f32 to vector<16x1xf32>
    %196 = arith.mulf %194, %195 : vector<16x1xf32>
    %197 = math.sqrt %196 : vector<16x1xf32>
    %cst_98 = arith.constant 9.99999997E-7 : f32
    %198 = vector.broadcast %cst_98 : f32 to vector<16x1xf32>
    %199 = arith.addf %197, %198 : vector<16x1xf32>
    %cst_99 = arith.constant 1.000000e+00 : f32
    %200 = vector.broadcast %cst_99 : f32 to vector<16x1xf32>
    %201 = arith.divf %200, %199 : vector<16x1xf32>
    %202 = vector.broadcast %201 : vector<16x1xf32> to vector<16x32xf32>
    %203 = arith.mulf %191, %202 : vector<16x32xf32>
    %204 = vector.broadcast %100 : vector<1x32xf32> to vector<16x32xf32>
    %205 = arith.mulf %204, %203 : vector<16x32xf32>
    %206 = vector.broadcast %101 : vector<1x32xf32> to vector<16x32xf32>
    %207 = arith.addf %205, %206 : vector<16x32xf32>
    %cst_100 = arith.constant dense<0.000000e+00> : vector<16x64xf32>
    %208 = tpu.matmul %207, %92, %cst_100 {dimension_numbers = #tpu.dot_dimension_numbers<[1], [0], [0], [1], [0, 0, 1, 1], [], []>} : vector<16x32xf32>, vector<32x64xf32>, vector<16x64xf32> -> vector<16x64xf32>
    %209 = vector.broadcast %98 : vector<1x64xf32> to vector<16x64xf32>
    %210 = arith.addf %208, %209 : vector<16x64xf32>
    %cst_101 = arith.constant 0.000000e+00 : f32
    %211 = vector.broadcast %cst_101 : f32 to vector<16x64xf32>
    %212 = arith.maximumf %210, %211 : vector<16x64xf32>
    %cst_102 = arith.constant dense<0.000000e+00> : vector<16x32xf32>
    %213 = tpu.matmul %212, %93, %cst_102 {dimension_numbers = #tpu.dot_dimension_numbers<[1], [0], [0], [1], [0, 0, 1, 1], [], []>} : vector<16x64xf32>, vector<64x32xf32>, vector<16x32xf32> -> vector<16x32xf32>
    %214 = arith.addf %185, %213 : vector<16x32xf32>
    %215 = vector.broadcast %99 : vector<1x32xf32> to vector<16x32xf32>
    %216 = arith.addf %214, %215 : vector<16x32xf32>
    %c132 = arith.constant 132 : index
    %c0_103 = arith.constant 0 : index
    %217 = vector.load %arg3[%c132, %c0_103] : memref<133x96xf32, #tpu.memory_space<vmem>>, vector<1x96xf32>
    %218 = vector.extract_strided_slice %217 {offsets = [0, 0], sizes = [1, 32], strides = [1, 1]} : vector<1x96xf32> to vector<1x32xf32>
    %219 = vector.extract_strided_slice %217 {offsets = [0, 32], sizes = [1, 32], strides = [1, 1]} : vector<1x96xf32> to vector<1x32xf32>
    %cst_104 = arith.constant dense<0.000000e+00> : vector<16xf32>
    %220 = vector.multi_reduction <add>, %216, %cst_104 [1] : vector<16x32xf32> to vector<16xf32>
    %221 = vector.shape_cast %220 : vector<16xf32> to vector<16x1xf32>
    %cst_105 = arith.constant 3.200000e+01 : f32
    %222 = vector.broadcast %cst_105 : f32 to vector<16x1xf32>
    %223 = arith.divf %221, %222 : vector<16x1xf32>
    %224 = vector.broadcast %223 : vector<16x1xf32> to vector<16x32xf32>
    %225 = arith.subf %216, %224 : vector<16x32xf32>
    %226 = arith.mulf %225, %225 : vector<16x32xf32>
    %cst_106 = arith.constant dense<0.000000e+00> : vector<16xf32>
    %227 = vector.multi_reduction <add>, %226, %cst_106 [1] : vector<16x32xf32> to vector<16xf32>
    %228 = vector.shape_cast %227 : vector<16xf32> to vector<16x1xf32>
    %cst_107 = arith.constant 0.0322580636 : f32
    %229 = vector.broadcast %cst_107 : f32 to vector<16x1xf32>
    %230 = arith.mulf %228, %229 : vector<16x1xf32>
    %231 = math.sqrt %230 : vector<16x1xf32>
    %cst_108 = arith.constant 9.99999997E-7 : f32
    %232 = vector.broadcast %cst_108 : f32 to vector<16x1xf32>
    %233 = arith.addf %231, %232 : vector<16x1xf32>
    %cst_109 = arith.constant 1.000000e+00 : f32
    %234 = vector.broadcast %cst_109 : f32 to vector<16x1xf32>
    %235 = arith.divf %234, %233 : vector<16x1xf32>
    %236 = vector.broadcast %235 : vector<16x1xf32> to vector<16x32xf32>
    %237 = arith.mulf %225, %236 : vector<16x32xf32>
    %238 = vector.broadcast %218 : vector<1x32xf32> to vector<16x32xf32>
    %239 = arith.mulf %238, %237 : vector<16x32xf32>
    %240 = vector.broadcast %219 : vector<1x32xf32> to vector<16x32xf32>
    %241 = arith.addf %239, %240 : vector<16x32xf32>
    %c0_110 = arith.constant 0 : index
    %c0_111 = arith.constant 0 : index
    %242 = vector.load %arg4[%c0_110, %c0_111] : memref<16x32xf32, #tpu.memory_space<vmem>>, vector<16x32xf32>
    tpu.vector_store %arg4[%c0_110, %c0_111], %241 {strides = array<i32>} : memref<16x32xf32, #tpu.memory_space<vmem>>, vector<16x32xf32>,
    return
  }
}

</mosaic_0001>

<bundles_post_ra>
// kernel: encoder_forward.1
= control target key start
LH: loop header
LB: loop body
LE: loop exit
PB: predicated region body
PF: predicated region fallthrough
CT: control target
= control target key end

     0   :  { %9 = vsyncpa [#allocation6], 0  ;;  %s2907_s0 = inlined_call_operand.vmem [shape: s32[16], index: 0, kind: input, shape index: {}]   ;;  %s2908_s1 = inlined_call_operand.vmem [shape: f32[2,1,8], index: 1, kind: input, shape index: {}]   ;;  %s2909_s2 = inlined_call_operand.vmem [shape: f32[50,1,32], index: 2, kind: input, shape index: {}]   ;;  %s2910_s3 = inlined_call_operand.hbm [shape: f32[133,96], index: 3, kind: input, shape index: {}]   ;;  %s2911_s4 = inlined_call_operand.hbm [shape: f32[16,32], index: 4, kind: output, shape index: {}]  }
   0x1   :  { %10 = vsyncpa [#allocation4], 0 }
   0x2   :  { %11 = vsyncpa [#allocation5], 0  ;;  %s18_s17 = sshll.u32 %s2907_s0, 4  ;;  %s19_s17 = int_to_ptr.vmem [resolvable:$true] %s18_s17 }
   0x3   :  { %s2455_s18 = scalar_lea.vmem %s19_s17, 16  ;;  %p2460_p1 = scmp.lt.s32.totalorder %s19_s17, %s19_s17 }
   0x4   :  { %p2456_p0 = scmp.ne.s32.totalorder %s19_s17, %s2455_s18  ;;  %p2461_p2 = scmp.lt.s32.totalorder %s2455_s18, %s2455_s18 }
   0x6   :  { %p2462_p3 = por %p2461_p2, %p2460_p1 }
   0x8   :  { %p2463_p4 = pnand %p2462_p3, %p2456_p0 }
   0xa   :  { %2466 = shalt.err (!%p2463_p4)
}
   0xb   :  { %s2517_s19 = smov [#allocation3]   ;;  %s2518_s20 = smov [#allocation7]  }
   0xc   :  { %21 = dma.vmem_to_smem %s19_s17, 16, %s2517_s19, [#allocation6]  }
   0xd   :  { %s31_s21 = sshll.u32 %s2518_s20, 4  ;;  %s2467_s24 = scalar_lea.hbm %s2910_s3, 2176  ;;  %s32_s21 = int_to_ptr.vmem [resolvable:$true] %s31_s21 }
   0xe   :  { %p2468_p5 = scmp.ne.s32.totalorder %s2910_s3, %s2467_s24  ;;  %p2471_p6 = scmp.lt.u32.totalorder %s2467_s24, %s2910_s3 }
  0x10   :  { %p2473_p7 = pnand %p2471_p6, %p2468_p5 }
  0x12   :  { %2476 = shalt.err (!%p2473_p7)
}
  0x13   :  { %s2477_s28 = scalar_lea.vmem %s32_s21, 2176  ;;  %p2482_p9 = scmp.lt.s32.totalorder %s32_s21, %s32_s21 }
  0x14   :  { %p2478_p8 = scmp.ne.s32.totalorder %s32_s21, %s2477_s28  ;;  %p2483_p10 = scmp.lt.s32.totalorder %s2477_s28, %s2477_s28 }
  0x16   :  { %p2484_p11 = por %p2483_p10, %p2482_p9 }
  0x18   :  { %p2485_p12 = pnand %p2484_p11, %p2478_p8 }
  0x1a   :  { %2488 = shalt.err (!%p2485_p12)
}
  0x1b   :  { %s2519_s29 = smov 128   ;;  %s2520_s30 = smov 8  }
  0x1c   :  { %37 = dma.hbm_to_vmem [thread:$0]  %s2910_s3, 2176, %s32_s21, [#allocation4], %s2519_s29, %s2519_s29, %s2520_s30  }
  0x1d   :  { %2511 = dma.done.wait [#allocation6], 16  }
  0x1e   :  { %2512 = vsyncadd [#allocation6], 4294967280 }
  0x1f   :  { %2513 = dma.done.wait [#allocation4], 2176  }
  0x20   :  { %2514 = vsyncadd [#allocation4], 4294965120 }
  0x21   :  { %44 = sfence }
  0x22   :  { %s45_s7 = sld [smem:[#allocation3]]  ;;  %s2088_s8 = sld [smem:[#allocation3 + $0x1]]  ;;  %vm48_vm0 = vcmask 253952   ;;  %vm135_vm1 = vcmask 261120   ;;  %v179_v48 = vlaneseq  ;;  %v118_v50 = vld [vmem:[#allocation7] sm:$0xff]  ;;  %v119_v51 = vld [vmem:[#allocation7 + $0x8] sm:$0xff] }
  0x23   :  { %s2089_s9 = sld [smem:[#allocation3 + $0x2]]  ;;  %s2090_s10 = sld [smem:[#allocation3 + $0x3]]  ;;  %v120_v52 = vld [vmem:[#allocation7 + $0x10] sm:$0xff]  ;;  %v2328_v53 = vpack.c.bf16 %v119_v51, %v118_v50  ;;  %v121_v54 = vld [vmem:[#allocation7 + $0x18] sm:$0xff]  ;;  %v2672_v58 = vld [vmem:[#allocation7 + $0x80] sm:$0xf] }
  0x24   :  { %s2091_s11 = sld [smem:[#allocation3 + $0x4]]  ;;  %s2092_s12 = sld [smem:[#allocation3 + $0x5]]  ;;  %v2669_v49 = vshrl.u32 %v179_v48, 7  ;;  %v2332_v55 = vpack.c.bf16 %v121_v54, %v120_v52  ;;  %vm2524_vm6 = vmmov 0   ;;  %vm291_vm7 = vcmask 64512  }
  0x25   :  { %s2093_s13 = sld [smem:[#allocation3 + $0x6]]  ;;  %s2094_s14 = sld [smem:[#allocation3 + $0x7]]  ;;  %2329 = vmatprep.subr.bf16.mxu1 %v2328_v53  ;;  %vm1661_vm10 = vcmask 130048   ;;  %vm1664_vm11 = vcmask 195584  }
  0x26   :  { %s2581_s15 = sld [smem:[#allocation3 + $0x8]]  ;;  %s2583_s16 = sld [smem:[#allocation3 + $0x9]]  ;;  %v181_v56 = vsub.s32 1, %v2669_v49  ;;  %2331 = vmatpush3.bf16.msra.mxu1 %v2328_v53 }
  0x27   :  { %s2585_s17 = sld [smem:[#allocation3 + $0xa]]  ;;  %s2587_s3 = sld [smem:[#allocation3 + $0xb]]  ;;  %2333 = vmatprep.subr.bf16.mxu1 %v2332_v55 }
  0x28   :  { %s46_s20 = scalar_lea.vmem %s2909_s2, %s45_s7  ;;  %s51_s23 = scalar_lea.vmem %s2909_s2, %s2088_s8  ;;  %v2675_v60 = vrot.slane %v2672_v58, %v181_v56 }
  0x29   :  { %v47_v0 = vld [vmem:[%s46_s20] sm:$0x1]  ;;  %s55_s26 = scalar_lea.vmem %s2909_s2, %s2089_s9  ;;  %s59_s28 = scalar_lea.vmem %s2909_s2, %s2090_s10 }
  0x2a   :  { %v52_v1 = vld [vmem:[%s51_s23] sm:$0x1]  ;;  %49 = vst.msk [vmem:[#allocation2] sm:$0x1] %vm48_vm0, %v47_v0  ;;  %s63_s7 = scalar_lea.vmem %s2909_s2, %s2091_s11  ;;  %s67_s9 = scalar_lea.vmem %s2909_s2, %s2092_s12  ;;  %2335 = vmatpush3.bf16.msra.mxu1 %v2332_v55 }
  0x2b   :  { %53 = vst.msk [vmem:[#allocation2 + $0x1] sm:$0x1] %vm48_vm0, %v52_v1  ;;  %v56_v2 = vld [vmem:[%s55_s26] sm:$0x1]  ;;  %s71_s20 = scalar_lea.vmem %s2909_s2, %s2093_s13  ;;  %s75_s11 = scalar_lea.vmem %s2909_s2, %s2094_s14 }
  0x2c   :  { %v60_v3 = vld [vmem:[%s59_s28] sm:$0x1]  ;;  %57 = vst.msk [vmem:[#allocation2 + $0x2] sm:$0x1] %vm48_vm0, %v56_v2  ;;  %s79_s24 = scalar_lea.vmem %s2909_s2, %s2581_s15  ;;  %s83_s0 = scalar_lea.vmem %s2909_s2, %s2583_s16 }
  0x2d   :  { %61 = vst.msk [vmem:[#allocation2 + $0x3] sm:$0x1] %vm48_vm0, %v60_v3  ;;  %v64_v4 = vld [vmem:[%s63_s7] sm:$0x1]  ;;  %s87_s27 = scalar_lea.vmem %s2909_s2, %s2585_s17  ;;  %s91_s6 = scalar_lea.vmem %s2909_s2, %s2587_s3 }
  0x2e   :  { %v68_v5 = vld [vmem:[%s67_s9] sm:$0x1]  ;;  %65 = vst.msk [vmem:[#allocation2 + $0x4] sm:$0x1] %vm48_vm0, %v64_v4  ;;  %s2099_s15 = sld [smem:[#allocation3 + $0xc]]  ;;  %s2100_s16 = sld [smem:[#allocation3 + $0xd]] }
  0x2f   :  { %69 = vst.msk [vmem:[#allocation2 + $0x5] sm:$0x1] %vm48_vm0, %v68_v5  ;;  %v72_v6 = vld [vmem:[%s71_s20] sm:$0x1]  ;;  %s2101_s7 = sld [smem:[#allocation3 + $0xe]]  ;;  %s2102_s8 = sld [smem:[#allocation3 + $0xf]] }
  0x30   :  { %v76_v7 = vld [vmem:[%s75_s11] sm:$0x1]  ;;  %73 = vst.msk [vmem:[#allocation2 + $0x6] sm:$0x1] %vm48_vm0, %v72_v6  ;;  %v2523_v6 = vmov 0.0   ;;  %s2525_s25 = smov 88  }
  0x31   :  { %77 = vst.msk [vmem:[#allocation2 + $0x7] sm:$0x1] %vm48_vm0, %v76_v7  ;;  %v80_v8 = vld [vmem:[%s79_s24] sm:$0x1]  ;;  %s2522_s24 = smov 96   ;;  %2207 = vmatprep.subr.mxu1 %v2523_v6  ;;  %2217 = vmatprep.subr.mxu0 %v2523_v6  ;;  %v2692_v7 = vsub.s32 0, %v2669_v49 }
  0x32   :  { %v84_v9 = vld [vmem:[%s83_s0] sm:$0x1]  ;;  %81 = vst.msk [vmem:[#allocation2 + $0x8] sm:$0x1] %vm48_vm0, %v80_v8  ;;  %2219 = vmatprep.mubr.msk.f32.mxu0 %vm2524_vm6, %v2523_v6  ;;  %s2526_s26 = smov 120   ;;  %s2527_s0 = smov 80  }
  0x33   :  { %85 = vst.msk [vmem:[#allocation2 + $0x9] sm:$0x1] %vm48_vm0, %v84_v9  ;;  %v88_v10 = vld [vmem:[%s87_s27] sm:$0x1]  ;;  %v202_v8 = vrot.slane %v2672_v58, %v2692_v7  ;;  %s2528_s13 = smov 112   ;;  %s2529_s14 = smov 72  }
  0x34   :  { %v92_v11 = vld [vmem:[%s91_s6] sm:$0x1]  ;;  %89 = vst.msk [vmem:[#allocation2 + $0xa] sm:$0x1] %vm48_vm0, %v88_v10  ;;  %s95_s3 = scalar_lea.vmem %s2909_s2, %s2099_s15  ;;  %s99_s19 = scalar_lea.vmem %s2909_s2, %s2100_s16 }
  0x35   :  { %93 = vst.msk [vmem:[#allocation2 + $0xb] sm:$0x1] %vm48_vm0, %v92_v11  ;;  %v96_v14 = vld [vmem:[%s95_s3] sm:$0x1]  ;;  %s103_s22 = scalar_lea.vmem %s2909_s2, %s2101_s7  ;;  %s107_s23 = scalar_lea.vmem %s2909_s2, %s2102_s8 }
  0x36   :  { %97 = vst.msk [vmem:[#allocation2 + $0xc] sm:$0x1] %vm48_vm0, %v96_v14  ;;  %v100_v15 = vld [vmem:[%s99_s19] sm:$0x1]  ;;  %s2521_s2 = smov 32   ;;  %s2530_s27 = smov 104  }
  0x37   :  { %v104_v16 = vld [vmem:[%s103_s22] sm:$0x1]  ;;  %101 = vst.msk [vmem:[#allocation2 + $0xd] sm:$0x1] %vm48_vm0, %v100_v15  ;;  %s2532_s16 = smov 56   ;;  %s2533_s7 = smov 48  }
  0x38   :  { %v2641_v12 = vld [vmem:[#allocation2] sm:$0xff]  ;;  %105 = vst.msk [vmem:[#allocation2 + $0xe] sm:$0x1] %vm48_vm0, %v104_v16  ;;  %s2534_s8 = smov 40   ;;  %s2535_s17 = smov 16  }
  0x39   :  { %v136_v13 = vsel %vm135_vm1, %v2641_v12, 0.0  ;;  %v108_v17 = vld [vmem:[%s107_s23] sm:$0x1]  ;;  %s2536_s18 = smov 24   ;;  %s2537_s3 = smov [#allocation8]  }
  0x3a   :  { %137 = vadd.xlane.f32.xlu0 %v136_v13  ;;  %109 = vst.msk [vmem:[#allocation2 + $0xf] sm:$0x1] %vm48_vm0, %v108_v17  ;;  %vm1907_vm0 = vcmask 523264   ;;  %s2059_s9 = sshll.u32 %s2537_s3, 4  ;;  %s2060_s9 = int_to_ptr.vmem [resolvable:$true] %s2059_s9 }
  0x3b   :  { %s2489_s10 = scalar_lea.vmem %s2060_s9, 256  ;;  %p2494_p0 = scmp.lt.s32.totalorder %s2060_s9, %s2060_s9 }
  0x3c   :  { %p2490_p13 = scmp.ne.s32.totalorder %s2060_s9, %s2489_s10  ;;  %p2495_p1 = scmp.lt.s32.totalorder %s2489_s10, %s2489_s10 }
  0x3e   :  { %p2496_p2 = por %p2495_p1, %p2494_p0 }
  0x40   :  { %p2497_p3 = pnand %p2496_p2, %p2490_p13 }
  0x41   :  { %v2661_v18 = vld [vmem:[#allocation2 + $0x8] sm:$0xff] }
  0x42   :  { %v139_v19 = vsel %vm135_vm1, %v2661_v18, 0.0 }
  0x43   :  { %140 = vadd.xlane.f32.xlu0 %v139_v19 }
  0xc7   :  { %v138_v20 = vpop.xlane.xlu0 %137 }
  0xc8   :  { %v143_v21 = vmul.f32 0.03125, %v138_v20 }
  0xca   :  { %v145_v22 = vsub.f32 %v2641_v12, %v143_v21 }
  0xcc   :  { %v147_v23 = vmul.f32 %v145_v22, %v145_v22 }
  0xce   :  { %v149_v24 = vsel %vm135_vm1, %v147_v23, 0.0 }
  0xcf   :  { %150 = vadd.xlane.f32.xlu1 %v149_v24 }
  0xd0   :  { %v141_v25 = vpop.xlane.xlu0 %140 }
  0xd1   :  { %v144_v26 = vmul.f32 0.03125, %v141_v25 }
  0xd3   :  { %v146_v27 = vsub.f32 %v2661_v18, %v144_v26 }
  0xd5   :  { %v148_v28 = vmul.f32 %v146_v27, %v146_v27 }
  0xd7   :  { %v152_v29 = vsel %vm135_vm1, %v148_v28, 0.0 }
  0xd8   :  { %153 = vadd.xlane.f32.xlu1 %v152_v29  ;;  %v112_v29 = vld [vmem:[%s2908_s1] sm:$0x1] }
  0xd9   :  { %vm114_vm8 = vcmp.eq.f32.partialorder %v112_v29, 0.0 }
 0x15c   :  { %v151_v30 = vpop.xlane.xlu1 %150 }
 0x15d   :  { %v155_v31 = vmul.f32 0.032258064, %v151_v30  ;;  %v116_v30 = vsel %vm114_vm8, -1e+09, %v2523_v6 }
 0x15f   :  { %2399 = vrsqrt.f32 %v155_v31  ;;  %vm159_vm2 = vcmp.eq.f32.partialorder %v155_v31, inf  ;;  %v162_v36 = vand.u32 2147483648, %v155_v31  ;;  %vm161_vm3 = vcmp.eq.f32.partialorder %v155_v31, 0.0 }
 0x165   :  { %v154_v32 = vpop.xlane.xlu1 %153 }
 0x166   :  { %v156_v33 = vmul.f32 0.032258064, %v154_v32  ;;  %v916_v32 = vrot.slane %v116_v30, %v2692_v7 }
 0x168   :  { %2401 = vrsqrt.f32 %v156_v33  ;;  %vm166_vm4 = vcmp.eq.f32.partialorder %v156_v33, inf  ;;  %v169_v42 = vand.u32 2147483648, %v156_v33  ;;  %vm168_vm5 = vcmp.eq.f32.partialorder %v156_v33, 0.0 }
 0x169   :  { %v2400_v34 = vpop.eup %2399 }
 0x16a   :  { %v158_v35 = vmul.f32 %v2400_v34, %v155_v31 }
 0x16c   :  { %v160_v37 = vsel %vm159_vm2, %v155_v31, %v158_v35  ;;  %v113_v31 = vld [vmem:[%s2908_s1 + $0x1] sm:$0x1]  ;;  %s2531_s1 = smov 64  }
 0x16d   :  { %v163_v38 = vsel %vm161_vm3, %v162_v36, %v160_v37  ;;  %vm115_vm9 = vcmp.eq.f32.partialorder %v113_v31, 0.0 }
 0x16e   :  { %v171_v39 = vadd.f32 1e-06, %v163_v38  ;;  %v117_v36 = vsel %vm115_vm9, -1e+09, %v2523_v6 }
 0x170   :  { %2403 = vrcp.f32 %v171_v39  ;;  %v920_v39 = vrot.slane %v117_v36, %v2692_v7 }
 0x172   :  { %v2402_v40 = vpop.eup %2401 }
 0x173   :  { %v165_v41 = vmul.f32 %v2402_v40, %v156_v33 }
 0x175   :  { %v167_v43 = vsel %vm166_vm4, %v156_v33, %v165_v41 }
 0x176   :  { %v170_v44 = vsel %vm168_vm5, %v169_v42, %v167_v43 }
 0x177   :  { %v172_v45 = vadd.f32 1e-06, %v170_v44 }
 0x179   :  { %2405 = vrcp.f32 %v172_v45 }
 0x17a   :  { %v2404_v46 = vpop.eup %2403 }
 0x17b   :  { %v177_v47 = vmul.f32 %v2404_v46, %v145_v22 }
 0x17d   :  { %185 = vrot.lane.b32.xlu0 %v177_v47, %s2521_s2 }
 0x183   :  { %v2406_v57 = vpop.eup %2405 }
 0x184   :  { %v178_v59 = vmul.f32 %v2406_v57, %v146_v27 }
 0x186   :  { %187 = vrot.lane.b32.xlu1 %v178_v59, %s2521_s2 }
 0x18a   :  { %194 = vrot.lane.b32.xlu1 %v2675_v60, %s2522_s24 }
 0x1ef   :  { %v186_v61 = vpop.permute.xlu0 %185 }
 0x1f0   :  { %v191_v63 = vmul.f32 %v186_v61, %v2675_v60 }
 0x1f8   :  { %v188_v62 = vpop.permute.xlu1 %187 }
 0x1f9   :  { %v192_v0 = vmul.f32 %v188_v62, %v2675_v60 }
 0x1fc   :  { %v195_v1 = vpop.permute.xlu1 %194 }
 0x1fd   :  { %v197_v2 = vadd.f32 %v195_v1, %v191_v63  ;;  %v198_v3 = vadd.f32 %v195_v1, %v192_v0 }
 0x1ff   :  { %207 = vrot.lane.b32.xlu0 %v198_v3, %s2522_s24  ;;  %205 = vrot.lane.b32.xlu1 %v197_v2, %s2522_s24 }
 0x271   :  { %v206_v4 = vpop.permute.xlu1 %205  ;;  %v208_v5 = vpop.permute.xlu0 %207 }
 0x272   :  { %2204 = vmatprep.mubr.msk.f32.mxu1 %vm135_vm1, %v206_v4 }
 0x273   :  { %2205 = vmatmul.mubr.msk.f32.vlgmr.msra.gmra.mrb[0].mxu1 %vm135_vm1, %v208_v5 }
 0x274   :  { %2209 = vmatprep.mubr.msk.f32.mxu1 %vm2524_vm6, %v2523_v6 }
 0x346   :  { %v2206_v9 = vpop.f32.mrb[0].mxu1 }
 0x347   :  { %v2696_v10 = vadd.f32 %v2206_v9, %v202_v8  ;;  %v279_v11 = vpop.f32.mrb[1].mxu1 }
 0x348   :  { %v2698_v13 = vadd.f32 %v279_v11, %v202_v8 }
 0x349   :  { %367 = vrot.lane.b32.xlu0 %v2696_v10, %s2522_s24 }
 0x34a   :  { %289 = vrot.lane.b32.xlu1 %v2698_v13, %s2522_s24 }
 0x34d   :  { %523 = vrot.lane.b32.xlu0 %v2696_v10, %s2525_s25 }
 0x34e   :  { %445 = vrot.lane.b32.xlu1 %v2698_v13, %s2525_s25 }
 0x351   :  { %521 = vrot.lane.b32.xlu0 %v2696_v10, %s2526_s26 }
 0x352   :  { %443 = vrot.lane.b32.xlu1 %v2698_v13, %s2526_s26 }
 0x355   :  { %679 = vrot.lane.b32.xlu0 %v2696_v10, %s2527_s0 }
 0x356   :  { %601 = vrot.lane.b32.xlu1 %v2698_v13, %s2527_s0 }
 0x359   :  { %677 = vrot.lane.b32.xlu0 %v2696_v10, %s2528_s13 }
 0x35a   :  { %599 = vrot.lane.b32.xlu1 %v2698_v13, %s2528_s13 }
 0x35d   :  { %835 = vrot.lane.b32.xlu0 %v2696_v10, %s2529_s14 }
 0x35e   :  { %757 = vrot.lane.b32.xlu1 %v2698_v13, %s2529_s14 }
 0x361   :  { %833 = vrot.lane.b32.xlu0 %v2696_v10, %s2530_s27 }
 0x362   :  { %755 = vrot.lane.b32.xlu1 %v2698_v13, %s2530_s27 }
 0x3bb   :  { %v368_v14 = vpop.permute.xlu0 %367 }
 0x3bc   :  { %v290_v15 = vpop.permute.xlu1 %289 }
 0x3bd   :  { %2208 = vmatpush3.xpose.msk.msra.mxu1 %vm291_vm7, %v290_v15 }
 0x3be   :  { %2212 = vmatprep.subr.mxu1 %v2523_v6 }
 0x3bf   :  { %v524_v16 = vpop.permute.xlu0 %523 }
 0x3c0   :  { %2210 = vmatmul.mubr.msk.f32.vlgmr.msra.gmra.mrb[2].mxu1 %vm291_vm7, %v2698_v13  ;;  %v446_v17 = vpop.permute.xlu1 %445 }
 0x3c1   :  { %2213 = vmatpush3.xpose.msk.msra.mxu1 %vm291_vm7, %v368_v14  ;;  %2218 = vmatpush3.xpose.msk.msra.mxu0 %vm291_vm7, %v446_v17 }
 0x3c2   :  { %2214 = vmatprep.mubr.msk.f32.mxu1 %vm2524_vm6, %v2523_v6  ;;  %2222 = vmatprep.subr.mxu1 %v2523_v6 }
 0x3c3   :  { %v522_v19 = vpop.permute.xlu0 %521  ;;  %2227 = vmatprep.subr.mxu0 %v2523_v6 }
 0x3c4   :  { %2215 = vmatmul.mubr.msk.f32.vlgmr.msra.gmra.mrb[4].mxu1 %vm291_vm7, %v2696_v10  ;;  %v444_v20 = vpop.permute.xlu1 %443 }
 0x3c5   :  { %2220 = vmatmul.mubr.msk.f32.vlgmr.msra.gmra.mrb[0].mxu0 %vm291_vm7, %v444_v20  ;;  %2223 = vmatpush3.xpose.msk.msra.mxu1 %vm291_vm7, %v524_v16 }
 0x3c6   :  { %2224 = vmatprep.mubr.msk.f32.mxu1 %vm2524_vm6, %v2523_v6  ;;  %2232 = vmatprep.subr.mxu1 %v2523_v6 }
 0x3c7   :  { %v680_v21 = vpop.permute.xlu0 %679  ;;  %2229 = vmatprep.mubr.msk.f32.mxu0 %vm2524_vm6, %v2523_v6 }
 0x3c8   :  { %2225 = vmatmul.mubr.msk.f32.vlgmr.msra.gmra.mrb[6].mxu1 %vm291_vm7, %v522_v19  ;;  %v602_v22 = vpop.permute.xlu1 %601 }
 0x3c9   :  { %2228 = vmatpush3.xpose.msk.msra.mxu0 %vm291_vm7, %v602_v22  ;;  %2233 = vmatpush3.xpose.msk.msra.mxu1 %vm291_vm7, %v680_v21 }
 0x3ca   :  { %2234 = vmatprep.mubr.msk.f32.mxu1 %vm2524_vm6, %v2523_v6  ;;  %2242 = vmatprep.subr.mxu1 %v2523_v6 }
 0x3cb   :  { %v678_v23 = vpop.permute.xlu0 %677  ;;  %2237 = vmatprep.subr.mxu0 %v2523_v6 }
 0x3cc   :  { %2235 = vmatmul.mubr.msk.f32.vlgmr.msra.gmra.mrb[8].mxu1 %vm291_vm7, %v678_v23  ;;  %v600_v24 = vpop.permute.xlu1 %599 }
 0x3cd   :  { %2230 = vmatmul.mubr.msk.f32.vlgmr.msra.gmra.mrb[2].mxu0 %vm291_vm7, %v600_v24  ;;  %2244 = vmatprep.mubr.msk.f32.mxu1 %vm2524_vm6, %v2523_v6 }
 0x3ce   :  { %2239 = vmatprep.mubr.msk.f32.mxu0 %vm2524_vm6, %v2523_v6 }
 0x3cf   :  { %v836_v25 = vpop.permute.xlu0 %835 }
 0x3d0   :  { %2243 = vmatpush3.xpose.msk.msra.mxu1 %vm291_vm7, %v836_v25  ;;  %v758_v26 = vpop.permute.xlu1 %757 }
 0x3d1   :  { %2238 = vmatpush3.xpose.msk.msra.mxu0 %vm291_vm7, %v758_v26  ;;  %2252 = vmatprep.subr.mxu1 %v2523_v6 }
 0x3d2   :  { %2247 = vmatprep.subr.mxu0 %v2523_v6 }
 0x3d3   :  { %v834_v27 = vpop.permute.xlu0 %833 }
 0x3d4   :  { %2245 = vmatmul.mubr.msk.f32.vlgmr.msra.gmra.mrb[10].mxu1 %vm291_vm7, %v834_v27  ;;  %v756_v28 = vpop.permute.xlu1 %755 }
 0x3d5   :  { %2240 = vmatmul.mubr.msk.f32.vlgmr.msra.gmra.mrb[4].mxu0 %vm291_vm7, %v756_v28  ;;  %2254 = vmatprep.mubr.msk.f32.mxu1 %vm2524_vm6, %v2523_v6 }
 0x3d6   :  { %2249 = vmatprep.mubr.msk.f32.mxu0 %vm2524_vm6, %v2523_v6 }
 0x493   :  { %v362_v33 = vpop.f32.mrb[2].mxu1 }
 0x494   :  { %v923_v34 = vadd.f32 %v916_v32, %v362_v33  ;;  %v2211_v35 = vpop.f32.mrb[3].mxu1 }
 0x496   :  { %v931_v37 = vsel %vm291_vm7, %v923_v34, -inf }
 0x497   :  { %932 = vmax.xlane.f32.xlu1 %v931_v37  ;;  %v439_v38 = vpop.f32.mrb[4].mxu1 }
 0x498   :  { %v2216_v40 = vpop.f32.mrb[5].mxu1  ;;  %v517_v41 = vpop.f32.mrb[0].mxu0  ;;  %v924_v44 = vadd.f32 %v920_v39, %v439_v38 }
 0x499   :  { %v925_v42 = vadd.f32 %v916_v32, %v517_v41  ;;  %v2221_v43 = vpop.f32.mrb[1].mxu0 }
 0x49a   :  { %v934_v51 = vsel %vm291_vm7, %v924_v44, -inf }
 0x49b   :  { %v595_v45 = vpop.f32.mrb[6].mxu1  ;;  %v937_v46 = vsel %vm291_vm7, %v925_v42, -inf }
 0x49c   :  { %v2226_v47 = vpop.f32.mrb[7].mxu1  ;;  %938 = vmax.xlane.f32.xlu0 %v937_v46  ;;  %v926_v48 = vadd.f32 %v920_v39, %v595_v45 }
 0x49e   :  { %v940_v57 = vsel %vm291_vm7, %v926_v48, -inf }
 0x49f   :  { %v751_v50 = vpop.f32.mrb[8].mxu1 }
 0x4a0   :  { %v2236_v52 = vpop.f32.mrb[9].mxu1  ;;  %935 = vmax.xlane.f32.xlu0 %v934_v51  ;;  %v673_v53 = vpop.f32.mrb[2].mxu0  ;;  %v928_v56 = vadd.f32 %v920_v39, %v751_v50 }
 0x4a1   :  { %v927_v54 = vadd.f32 %v916_v32, %v673_v53  ;;  %v2231_v55 = vpop.f32.mrb[3].mxu0 }
 0x4a2   :  { %v946_v62 = vsel %vm291_vm7, %v928_v56, -inf }
 0x4a3   :  { %v943_v59 = vsel %vm291_vm7, %v927_v54, -inf }
 0x4a4   :  { %941 = vmax.xlane.f32.xlu0 %v940_v57  ;;  %944 = vmax.xlane.f32.xlu1 %v943_v59 }
 0x4a7   :  { %v907_v61 = vpop.f32.mrb[10].mxu1 }
 0x4a8   :  { %v930_v63 = vadd.f32 %v920_v39, %v907_v61  ;;  %v2246_v0 = vpop.f32.mrb[11].mxu1  ;;  %947 = vmax.xlane.f32.xlu0 %v946_v62  ;;  %v829_v1 = vpop.f32.mrb[4].mxu0 }
 0x4a9   :  { %v929_v2 = vadd.f32 %v916_v32, %v829_v1  ;;  %v2241_v3 = vpop.f32.mrb[5].mxu0 }
 0x4aa   :  { %v952_v4 = vsel %vm291_vm7, %v930_v63, -inf }
 0x4ab   :  { %v949_v5 = vsel %vm291_vm7, %v929_v2, -inf }
 0x4ac   :  { %953 = vmax.xlane.f32.xlu0 %v952_v4  ;;  %950 = vmax.xlane.f32.xlu1 %v949_v5 }
 0x4bd   :  { %1027 = vrot.lane.b32.xlu1 %v2698_v13, %s2531_s1 }
 0x4c1   :  { %1179 = vrot.lane.b32.xlu1 %v2698_v13, %s2532_s16 }
 0x4c2   :  { %1103 = vrot.lane.b32.xlu0 %v2696_v10, %s2531_s1 }
 0x4c5   :  { %1255 = vrot.lane.b32.xlu1 %v2696_v10, %s2532_s16 }
 0x4c6   :  { %1407 = vrot.lane.b32.xlu0 %v2696_v10, %s2533_s7 }
 0x4c9   :  { %1331 = vrot.lane.b32.xlu1 %v2698_v13, %s2533_s7 }
 0x524   :  { %v933_v7 = vpop.xlane.xlu1 %932 }
 0x525   :  { %v955_v8 = vsub.f32 %v923_v34, %v933_v7 }
 0x527   :  { %v963_v9 = vmul.f32 1.442695, %v955_v8 }
 0x529   :  { %2407 = vpow2.f32 %v963_v9  ;;  %v939_v11 = vpop.xlane.xlu0 %938 }
 0x52a   :  { %v957_v14 = vsub.f32 %v925_v42, %v939_v11 }
 0x52c   :  { %v967_v15 = vmul.f32 1.442695, %v957_v14 }
 0x52d   :  { %v936_v16 = vpop.xlane.xlu0 %935 }
 0x52e   :  { %2409 = vpow2.f32 %v967_v15  ;;  %v956_v17 = vsub.f32 %v924_v44, %v936_v16 }
 0x530   :  { %v965_v19 = vmul.f32 1.442695, %v956_v17 }
 0x531   :  { %v942_v20 = vpop.xlane.xlu0 %941  ;;  %v945_v21 = vpop.xlane.xlu1 %944 }
 0x532   :  { %2411 = vpow2.f32 %v965_v19  ;;  %v958_v22 = vsub.f32 %v926_v48, %v942_v20  ;;  %v959_v23 = vsub.f32 %v927_v54, %v945_v21 }
 0x533   :  { %v2408_v24 = vpop.eup %2407 }
 0x534   :  { %v969_v25 = vmul.f32 1.442695, %v958_v22  ;;  %v971_v26 = vmul.f32 1.442695, %v959_v23  ;;  %v979_v27 = vsel %vm291_vm7, %v2408_v24, 0.0 }
 0x535   :  { %v948_v28 = vpop.xlane.xlu0 %947  ;;  %980 = vadd.xlane.f32.xlu1 %v979_v27  ;;  %v122_v27 = vld [vmem:[#allocation7 + $0x20] sm:$0xff] }
 0x536   :  { %2413 = vpow2.f32 %v969_v25  ;;  %v960_v29 = vsub.f32 %v928_v56, %v948_v28  ;;  %v123_v28 = vld [vmem:[#allocation7 + $0x28] sm:$0xff] }
 0x537   :  { %2415 = vpow2.f32 %v971_v26 }
 0x538   :  { %v2410_v30 = vpop.eup %2409  ;;  %v973_v31 = vmul.f32 1.442695, %v960_v29  ;;  %v2336_v29 = vpack.c.bf16 %v123_v28, %v122_v27 }
 0x539   :  { %v954_v32 = vpop.xlane.xlu0 %953  ;;  %v951_v33 = vpop.xlane.xlu1 %950  ;;  %v985_v34 = vsel %vm291_vm7, %v2410_v30, 0.0 }
 0x53a   :  { %2417 = vpow2.f32 %v973_v31  ;;  %v962_v35 = vsub.f32 %v930_v63, %v954_v32  ;;  %v961_v36 = vsub.f32 %v929_v2, %v951_v33  ;;  %986 = vadd.xlane.f32.xlu1 %v985_v34  ;;  %v2828_v31 = vld [vmem:[#allocation7 + $0x30] sm:$0xff]  ;;  %v2830_v32 = vld [vmem:[#allocation7 + $0x38] sm:$0xff] }
 0x53b   :  { %v2340_v33 = vpack.c.bf16 %v2830_v32, %v2828_v31 }
 0x53c   :  { %v2412_v37 = vpop.eup %2411  ;;  %v977_v38 = vmul.f32 1.442695, %v962_v35  ;;  %v975_v39 = vmul.f32 1.442695, %v961_v36 }
 0x53d   :  { %v1104_v40 = vpop.permute.xlu0 %1103  ;;  %v1028_v41 = vpop.permute.xlu1 %1027  ;;  %v982_v42 = vsel %vm291_vm7, %v2412_v37, 0.0 }
 0x53e   :  { %2419 = vpow2.f32 %v977_v38  ;;  %983 = vadd.xlane.f32.xlu0 %v982_v42  ;;  %2248 = vmatpush3.msra.mxu0 %v1028_v41 }
 0x53f   :  { %2421 = vpow2.f32 %v975_v39  ;;  %2253 = vmatpush3.msra.mxu1 %v1104_v40  ;;  %2257 = vmatprep.subr.mxu0 %v2523_v6 }
 0x540   :  { %v2414_v43 = vpop.eup %2413  ;;  %2262 = vmatprep.subr.mxu1 %v2523_v6 }
 0x541   :  { %v2416_v44 = vpop.eup %2415  ;;  %v988_v45 = vsel %vm291_vm7, %v2414_v43, 0.0  ;;  %v1180_v54 = vpop.permute.xlu1 %1179 }
 0x542   :  { %989 = vadd.xlane.f32.xlu0 %v988_v45  ;;  %v991_v46 = vsel %vm291_vm7, %v2416_v44, 0.0  ;;  %v1408_v59 = vpop.permute.xlu0 %1407 }
 0x543   :  { %992 = vadd.xlane.f32.xlu1 %v991_v46 }
 0x544   :  { %v2418_v47 = vpop.eup %2417 }
 0x545   :  { %v994_v48 = vsel %vm291_vm7, %v2418_v47, 0.0  ;;  %v1256_v55 = vpop.permute.xlu1 %1255 }
 0x546   :  { %995 = vadd.xlane.f32.xlu0 %v994_v48 }
 0x548   :  { %v2792_v50 = vpop.eup %2419 }
 0x549   :  { %v2794_v51 = vpop.eup %2421  ;;  %v1000_v52 = vsel %vm291_vm7, %v2792_v50, 0.0  ;;  %v1332_v56 = vpop.permute.xlu1 %1331 }
 0x54a   :  { %1001 = vadd.xlane.f32.xlu0 %v1000_v52  ;;  %v997_v53 = vsel %vm291_vm7, %v2794_v51, 0.0 }
 0x54b   :  { %998 = vadd.xlane.f32.xlu1 %v997_v53 }
 0x55c   :  { %1483 = vrot.lane.b32.xlu1 %v2698_v13, %s2534_s8 }
 0x560   :  { %1559 = vrot.lane.b32.xlu0 %v2696_v10, %s2534_s8 }
 0x5c2   :  { %v981_v57 = vpop.xlane.xlu1 %980 }
 0x5c3   :  { %2423 = vrcp.f32 %v981_v57 }
 0x5c7   :  { %v987_v61 = vpop.xlane.xlu1 %986 }
 0x5c8   :  { %2425 = vrcp.f32 %v987_v61 }
 0x5cb   :  { %v984_v62 = vpop.xlane.xlu0 %983 }
 0x5cc   :  { %2427 = vrcp.f32 %v984_v62 }
 0x5cd   :  { %v2424_v63 = vpop.eup %2423 }
 0x5ce   :  { %v1019_v0 = vmul.f32 %v2424_v63, %v2408_v24 }
 0x5cf   :  { %v990_v1 = vpop.xlane.xlu0 %989 }
 0x5d0   :  { %2429 = vrcp.f32 %v990_v1  ;;  %v993_v2 = vpop.xlane.xlu1 %992  ;;  %2250 = vmatmul.mubr.msk.f32.vlgmr.msra.gmra.mrb[6].mxu0 %vm291_vm7, %v1019_v0 }
 0x5d1   :  { %2431 = vrcp.f32 %v993_v2  ;;  %2258 = vmatpush3.msra.mxu0 %v1180_v54  ;;  %2259 = vmatprep.mubr.msk.f32.mxu0 %vm2524_vm6, %v2523_v6 }
 0x5d2   :  { %v2426_v10 = vpop.eup %2425  ;;  %2267 = vmatprep.subr.mxu0 %v2523_v6 }
 0x5d3   :  { %v1021_v13 = vmul.f32 %v2426_v10, %v2410_v30  ;;  %v996_v3 = vpop.xlane.xlu0 %995 }
 0x5d4   :  { %2433 = vrcp.f32 %v996_v3  ;;  %v2389_v3 = vpack.i.bf16 %v123_v28, %v122_v27  ;;  %v129_v28 = vld [vmem:[#allocation7 + $0x58] sm:$0xff] }
 0x5d5   :  { %2260 = vmatmul.mubr.msk.f32.vlgmr.msra.gmra.mrb[8].mxu0 %vm291_vm7, %v1021_v13 }
 0x5d6   :  { %v2428_v4 = vpop.eup %2427  ;;  %2268 = vmatpush3.msra.mxu0 %v1332_v56  ;;  %2269 = vmatprep.mubr.msk.f32.mxu0 %vm2524_vm6, %v2523_v6 }
 0x5d7   :  { %v1020_v5 = vmul.f32 %v2428_v4, %v2412_v37  ;;  %v1002_v7 = vpop.xlane.xlu0 %1001  ;;  %2277 = vmatprep.subr.mxu0 %v2523_v6  ;;  %v1794_v4 = vsub.s32 3, %v2669_v49 }
 0x5d8   :  { %2435 = vrcp.f32 %v1002_v7  ;;  %v999_v8 = vpop.xlane.xlu1 %998 }
 0x5d9   :  { %2437 = vrcp.f32 %v999_v8  ;;  %2255 = vmatmul.mubr.msk.f32.vlgmr.msra.gmra.mrb[12].mxu1 %vm291_vm7, %v1020_v5 }
 0x5da   :  { %v2430_v9 = vpop.eup %2429  ;;  %2263 = vmatpush3.msra.mxu1 %v1256_v55  ;;  %2264 = vmatprep.mubr.msk.f32.mxu1 %vm2524_vm6, %v2523_v6 }
 0x5db   :  { %v2432_v11 = vpop.eup %2431  ;;  %v1022_v14 = vmul.f32 %v2430_v9, %v2414_v43  ;;  %2272 = vmatprep.subr.mxu1 %v2523_v6  ;;  %v1560_v20 = vpop.permute.xlu0 %1559 }
 0x5dc   :  { %v1023_v15 = vmul.f32 %v2432_v11, %v2416_v44  ;;  %v1484_v16 = vpop.permute.xlu1 %1483 }
 0x5dd   :  { %2265 = vmatmul.mubr.msk.f32.vlgmr.msra.gmra.mrb[14].mxu1 %vm291_vm7, %v1022_v14 }
 0x5de   :  { %v2434_v17 = vpop.eup %2433  ;;  %2270 = vmatmul.mubr.msk.f32.vlgmr.msra.gmra.mrb[10].mxu0 %vm291_vm7, %v1023_v15  ;;  %2273 = vmatpush3.msra.mxu1 %v1408_v59 }
 0x5df   :  { %v1024_v19 = vmul.f32 %v2434_v17, %v2418_v47  ;;  %2278 = vmatpush3.msra.mxu0 %v1484_v16  ;;  %2274 = vmatprep.mubr.msk.f32.mxu1 %vm2524_vm6, %v2523_v6  ;;  %v2394_v17 = vpack.i.bf16 %v2830_v32, %v2828_v31 }
 0x5e0   :  { %2282 = vmatprep.subr.mxu1 %v2523_v6  ;;  %2279 = vmatprep.mubr.msk.f32.mxu0 %vm2524_vm6, %v2523_v6 }
 0x5e1   :  { %2275 = vmatmul.mubr.msk.f32.vlgmr.msra.gmra.mrb[16].mxu1 %vm291_vm7, %v1024_v19  ;;  %2337 = vmatprep.subr.bf16.mxu0 %v2336_v29 }
 0x5e2   :  { %v2436_v21 = vpop.eup %2435  ;;  %2283 = vmatpush3.msra.mxu1 %v1560_v20  ;;  %2284 = vmatprep.mubr.msk.f32.mxu1 %vm2524_vm6, %v2523_v6 }
 0x5e3   :  { %v2438_v22 = vpop.eup %2437  ;;  %v1026_v23 = vmul.f32 %v2436_v21, %v2792_v50 }
 0x5e4   :  { %v1025_v24 = vmul.f32 %v2438_v22, %v2794_v51 }
 0x5e5   :  { %2285 = vmatmul.mubr.msk.f32.vlgmr.msra.gmra.mrb[18].mxu1 %vm291_vm7, %v1026_v23  ;;  %v126_v23 = vld [vmem:[#allocation7 + $0x40] sm:$0xff] }
 0x5e6   :  { %2280 = vmatmul.mubr.msk.f32.vlgmr.msra.gmra.mrb[12].mxu0 %vm291_vm7, %v1025_v24  ;;  %v127_v24 = vld [vmem:[#allocation7 + $0x48] sm:$0xff] }
 0x5e7   :  { %2339 = vmatpush3.bf16.msra.mxu0 %v2336_v29  ;;  %v2352_v27 = vpack.c.bf16 %v127_v24, %v126_v23 }
 0x5e8   :  { %2341 = vmatprep.subr.bf16.mxu0 %v2340_v33 }
 0x5eb   :  { %2343 = vmatpush3.bf16.msra.mxu0 %v2340_v33 }
 0x5ec   :  { %2353 = vmatprep.subr.bf16.mxu0 %v2352_v27 }
 0x6a3   :  { %v1099_v25 = vpop.f32.mrb[6].mxu0 }
 0x6a4   :  { %v2251_v26 = vpop.f32.mrb[7].mxu0 }
 0x6a5   :  { %v1806_v26 = vsub.s32 2, %v2669_v49 }
 0x6a7   :  { %v1807_v31 = vrot.slane %v2672_v58, %v1806_v26 }
 0x6a8   :  { %v1251_v30 = vpop.f32.mrb[8].mxu0 }
 0x6a9   :  { %1637 = vrot.lane.b32.xlu1 %v1251_v30, %s2520_s30  ;;  %v2261_v6 = vpop.f32.mrb[9].mxu0  ;;  %v130_v30 = vld [vmem:[#allocation7 + $0x60] sm:$0xff] }
 0x6aa   :  { %v131_v6 = vld [vmem:[#allocation7 + $0x68] sm:$0xff] }
 0x6ab   :  { %v2360_v32 = vpack.c.bf16 %v131_v6, %v130_v30 }
 0x6ac   :  { %v1175_v34 = vpop.f32.mrb[12].mxu1 }
 0x6ad   :  { %v2256_v35 = vpop.f32.mrb[13].mxu1 }
 0x6b0   :  { %v1327_v36 = vpop.f32.mrb[14].mxu1 }
 0x6b1   :  { %v1403_v37 = vpop.f32.mrb[10].mxu0  ;;  %1639 = vrot.lane.b32.xlu0 %v1327_v36, %s2520_s30  ;;  %v2266_v38 = vpop.f32.mrb[15].mxu1 }
 0x6b2   :  { %1645 = vrot.lane.b32.xlu1 %v1403_v37, %s2535_s17  ;;  %v2271_v39 = vpop.f32.mrb[11].mxu0 }
 0x6b4   :  { %v1479_v40 = vpop.f32.mrb[16].mxu1 }
 0x6b5   :  { %1647 = vrot.lane.b32.xlu0 %v1479_v40, %s2535_s17  ;;  %v2276_v41 = vpop.f32.mrb[17].mxu1 }
 0x6b8   :  { %v1631_v42 = vpop.f32.mrb[18].mxu1 }
 0x6b9   :  { %v1555_v43 = vpop.f32.mrb[12].mxu0  ;;  %1655 = vrot.lane.b32.xlu0 %v1631_v42, %s2536_s18  ;;  %v2286_v44 = vpop.f32.mrb[19].mxu1 }
 0x6ba   :  { %1653 = vrot.lane.b32.xlu1 %v1555_v43, %s2536_s18  ;;  %v2281_v45 = vpop.f32.mrb[13].mxu0 }
 0x71b   :  { %v1638_v47 = vpop.permute.xlu1 %1637 }
 0x71c   :  { %v1659_v52 = vsel %vm291_vm7, %v1099_v25, %v1638_v47  ;;  %v128_v25 = vld [vmem:[#allocation7 + $0x50] sm:$0xff] }
 0x71d   :  { %v2356_v29 = vpack.c.bf16 %v129_v28, %v128_v25 }
 0x723   :  { %v1640_v46 = vpop.permute.xlu0 %1639 }
 0x724   :  { %v1646_v50 = vpop.permute.xlu1 %1645  ;;  %v1660_v51 = vsel %vm291_vm7, %v1175_v34, %v1640_v46 }
 0x725   :  { %v1662_v55 = vsel %vm1661_vm10, %v1659_v52, %v1646_v50 }
 0x727   :  { %v1648_v48 = vpop.permute.xlu0 %1647 }
 0x728   :  { %v1663_v53 = vsel %vm1661_vm10, %v1660_v51, %v1648_v48 }
 0x72b   :  { %v1656_v54 = vpop.permute.xlu0 %1655 }
 0x72c   :  { %v1666_v56 = vsel %vm1664_vm11, %v1663_v53, %v1656_v54  ;;  %v1654_v57 = vpop.permute.xlu1 %1653 }
 0x72d   :  { %v1665_v59 = vsel %vm1664_vm11, %v1662_v55, %v1654_v57 }
 0x72e   :  { %2295 = vmatprep.mubr.msk.f32.mxu0 %vm135_vm1, %v1665_v59 }
 0x72f   :  { %2296 = vmatmul.mubr.msk.f32.vlgmr.msra.gmra.mrb[14].mxu0 %vm135_vm1, %v1666_v56 }
 0x730   :  { %2355 = vmatpush3.bf16.msra.mxu0 %v2352_v27 }
 0x731   :  { %2357 = vmatprep.subr.bf16.mxu0 %v2356_v29 }
 0x734   :  { %2359 = vmatpush3.bf16.msra.mxu0 %v2356_v29 }
 0x735   :  { %2361 = vmatprep.subr.bf16.mxu0 %v2360_v32 }
 0x738   :  { %2363 = vmatpush3.bf16.msra.mxu0 %v2360_v32 }
 0x802   :  { %v2297_v61 = vpop.f32.mrb[14].mxu0 }
 0x803   :  { %v1745_v62 = vadd.f32 %v2297_v61, %v2675_v60  ;;  %v1739_v63 = vpop.f32.mrb[15].mxu0 }
 0x804   :  { %v1740_v0 = vadd.f32 %v1739_v63, %v2675_v60  ;;  %v2855_v60 = vrot.slane %v2672_v58, %v1794_v4  ;;  %v132_v63 = vld [vmem:[#allocation7 + $0x70] sm:$0xff] }
 0x805   :  { %v2843_v1 = vadd.f32 %v1745_v62, %v2661_v18 }
 0x806   :  { %v2846_v2 = vadd.f32 %v1740_v0, %v2641_v12  ;;  %v133_v0 = vld [vmem:[#allocation7 + $0x78] sm:$0xff] }
 0x807   :  { %v1753_v10 = vsel %vm135_vm1, %v2843_v1, 0.0 }
 0x808   :  { %1754 = vadd.xlane.f32.xlu0 %v1753_v10  ;;  %v1750_v13 = vsel %vm135_vm1, %v2846_v2, 0.0  ;;  %v2364_v10 = vpack.c.bf16 %v133_v0, %v132_v63 }
 0x809   :  { %1751 = vadd.xlane.f32.xlu1 %v1750_v13 }
 0x80a   :  { %2365 = vmatprep.subr.bf16.mxu0 %v2364_v10 }
 0x80b   :  { %2367 = vmatpush3.bf16.msra.mxu0 %v2364_v10 }
 0x81a   :  { %2390 = vrot.lane.b32.xlu1 %v2389_v3, %s2522_s24 }
 0x81e   :  { %1799 = vrot.lane.b32.xlu1 %v2855_v60, %s2522_s24 }
 0x822   :  { %1992 = vrot.lane.b32.xlu1 %v1807_v31, %s2531_s1 }
 0x895   :  { %v1755_v12 = vpop.xlane.xlu0 %1754 }
 0x896   :  { %v1757_v18 = vmul.f32 0.03125, %v1755_v12  ;;  %v1752_v5 = vpop.xlane.xlu1 %1751 }
 0x897   :  { %v1756_v7 = vmul.f32 0.03125, %v1752_v5 }
 0x898   :  { %v2860_v8 = vsub.f32 %v2843_v1, %v1757_v18 }
 0x899   :  { %v2863_v9 = vsub.f32 %v2846_v2, %v1756_v7 }
 0x89a   :  { %v1761_v15 = vmul.f32 %v2860_v8, %v2860_v8  ;;  %v2391_v19 = vpop.permute.xlu1 %2390 }
 0x89b   :  { %v1760_v11 = vmul.f32 %v2863_v9, %v2863_v9  ;;  %v2393_v20 = vunpack.i.h.bf16 %v2391_v19  ;;  %v2392_v21 = vunpack.i.l.bf16 %v2391_v19  ;;  %v2135_v19 = vld [vmem:[#allocation7 + $0x84] ss:$0 sm:$0xff] }
 0x89c   :  { %v1765_v16 = vsel %vm135_vm1, %v1761_v15, 0.0 }
 0x89d   :  { %v1762_v14 = vsel %vm135_vm1, %v1760_v11, 0.0  ;;  %v2344_v22 = vpack.c.bf16 %v2393_v20, %v2392_v21 }
 0x89e   :  { %1763 = vadd.xlane.f32.xlu0 %v1762_v14  ;;  %v1800_v54 = vpop.permute.xlu1 %1799 }
 0x89f   :  { %2345 = vmatprep.subr.bf16.mxu1 %v2344_v22 }
 0x8a0   :  { %2347 = vmatpush3.bf16.msra.mxu1 %v2344_v22 }
 0x8a2   :  { %1766 = vadd.xlane.f32.xlu0 %v1765_v16  ;;  %v1993_v7 = vpop.permute.xlu1 %1992 }
 0x8b8   :  { %2395 = vrot.lane.b32.xlu0 %v2394_v17, %s2522_s24 }
 0x92b   :  { %v1764_v33 = vpop.xlane.xlu0 %1763 }
 0x92c   :  { %v1768_v34 = vmul.f32 0.032258064, %v1764_v33 }
 0x92e   :  { %2439 = vrsqrt.f32 %v1768_v34  ;;  %vm1772_vm12 = vcmp.eq.f32.partialorder %v1768_v34, inf  ;;  %v1775_v41 = vand.u32 2147483648, %v1768_v34  ;;  %vm1774_vm13 = vcmp.eq.f32.partialorder %v1768_v34, 0.0 }
 0x92f   :  { %v1767_v49 = vpop.xlane.xlu0 %1766 }
 0x930   :  { %v1769_v35 = vmul.f32 0.032258064, %v1767_v49 }
 0x932   :  { %2441 = vrsqrt.f32 %v1769_v35  ;;  %vm1779_vm14 = vcmp.eq.f32.partialorder %v1769_v35, inf  ;;  %v1782_v47 = vand.u32 2147483648, %v1769_v35  ;;  %vm1781_vm15 = vcmp.eq.f32.partialorder %v1769_v35, 0.0 }
 0x933   :  { %v2396_v36 = vpop.permute.xlu0 %2395 }
 0x934   :  { %v2398_v37 = vunpack.i.h.bf16 %v2396_v36  ;;  %v2397_v38 = vunpack.i.l.bf16 %v2396_v36 }
 0x936   :  { %v2348_v39 = vpack.c.bf16 %v2398_v37, %v2397_v38 }
 0x938   :  { %v2440_v58 = vpop.eup %2439  ;;  %2349 = vmatprep.subr.bf16.mxu1 %v2348_v39 }
 0x939   :  { %v1771_v40 = vmul.f32 %v2440_v58, %v1768_v34  ;;  %2351 = vmatpush3.bf16.msra.mxu1 %v2348_v39 }
 0x93b   :  { %v1773_v42 = vsel %vm1772_vm12, %v1768_v34, %v1771_v40 }
 0x93c   :  { %v2442_v43 = vpop.eup %2441  ;;  %v1776_v44 = vsel %vm1774_vm13, %v1775_v41, %v1773_v42 }
 0x93d   :  { %v1778_v45 = vmul.f32 %v2442_v43, %v1769_v35  ;;  %v1784_v46 = vadd.f32 1e-06, %v1776_v44 }
 0x93f   :  { %v1780_v48 = vsel %vm1779_vm14, %v1769_v35, %v1778_v45  ;;  %2443 = vrcp.f32 %v1784_v46 }
 0x940   :  { %v1783_v50 = vsel %vm1781_vm15, %v1782_v47, %v1780_v48 }
 0x941   :  { %v1785_v51 = vadd.f32 1e-06, %v1783_v50 }
 0x943   :  { %2445 = vrcp.f32 %v1785_v51 }
 0x949   :  { %v2444_v52 = vpop.eup %2443 }
 0x94a   :  { %v1790_v53 = vmul.f32 %v2444_v52, %v2863_v9 }
 0x94c   :  { %v1796_v55 = vmul.f32 %v2855_v60, %v1790_v53 }
 0x94d   :  { %v2446_v56 = vpop.eup %2445 }
 0x94e   :  { %v1791_v57 = vmul.f32 %v2446_v56, %v2860_v8  ;;  %v1802_v59 = vadd.f32 %v1800_v54, %v1796_v55 }
 0x950   :  { %v1797_v61 = vmul.f32 %v2855_v60, %v1791_v57  ;;  %2306 = vmatprep.mubr.msk.f32.mxu1 %vm135_vm1, %v1802_v59 }
 0x952   :  { %v1803_v62 = vadd.f32 %v1800_v54, %v1797_v61 }
 0x954   :  { %2307 = vmatmul.mubr.msk.f32.vlgmr.msra.gmra.mrb[20].mxu1 %vm135_vm1, %v1803_v62 }
 0xa27   :  { %v2308_v13 = vpop.f32.mrb[20].mxu1 }
 0xa28   :  { %v1902_v3 = vadd.f32 %v2308_v13, %v1807_v31  ;;  %v1896_v4 = vpop.f32.mrb[21].mxu1 }
 0xa29   :  { %v1897_v12 = vadd.f32 %v1896_v4, %v1807_v31 }
 0xa2a   :  { %v1906_v5 = vmax.f32 %v1902_v3, 0.0 }
 0xa2b   :  { %v1905_v18 = vmax.f32 %v1897_v12, 0.0 }
 0xa2d   :  { %2325 = vmatprep.mubr.msk.f32.mxu0 %vm1907_vm0, %v1905_v18 }
 0xa2e   :  { %2326 = vmatmul.mubr.msk.f32.vlgmr.msra.gmra.mrb[16].mxu0 %vm1907_vm0, %v1906_v5 }
 0xb01   :  { %v2327_v60 = vpop.f32.mrb[16].mxu0 }
 0xb02   :  { %v1990_v8 = vadd.f32 %v2327_v60, %v2843_v1  ;;  %v1980_v9 = vpop.f32.mrb[17].mxu0 }
 0xb03   :  { %v1989_v11 = vadd.f32 %v1980_v9, %v2846_v2 }
 0xb04   :  { %v1996_v14 = vadd.f32 %v1993_v7, %v1990_v8 }
 0xb05   :  { %v1995_v15 = vadd.f32 %v1993_v7, %v1989_v11 }
 0xb06   :  { %v2001_v16 = vsel %vm135_vm1, %v1996_v14, 0.0 }
 0xb07   :  { %2002 = vadd.xlane.f32.xlu0 %v2001_v16  ;;  %v1998_v17 = vsel %vm135_vm1, %v1995_v15, 0.0 }
 0xb08   :  { %1999 = vadd.xlane.f32.xlu1 %v1998_v17 }
 0xb19   :  { %2047 = vrot.lane.b32.xlu1 %v2135_v19, %s2522_s24 }
 0xb94   :  { %v2003_v20 = vpop.xlane.xlu0 %2002 }
 0xb95   :  { %v2005_v21 = vmul.f32 0.03125, %v2003_v20  ;;  %v2000_v22 = vpop.xlane.xlu1 %1999 }
 0xb96   :  { %v2004_v23 = vmul.f32 0.03125, %v2000_v22 }
 0xb97   :  { %v2007_v24 = vsub.f32 %v1996_v14, %v2005_v21 }
 0xb98   :  { %v2006_v1 = vsub.f32 %v1995_v15, %v2004_v23 }
 0xb99   :  { %v2009_v26 = vmul.f32 %v2007_v24, %v2007_v24  ;;  %v2048_v43 = vpop.permute.xlu1 %2047 }
 0xb9a   :  { %v2008_v25 = vmul.f32 %v2006_v1, %v2006_v1 }
 0xb9b   :  { %v2013_v27 = vsel %vm135_vm1, %v2009_v26, 0.0 }
 0xb9c   :  { %v2010_v2 = vsel %vm135_vm1, %v2008_v25, 0.0 }
 0xb9d   :  { %2011 = vadd.xlane.f32.xlu0 %v2010_v2 }
 0xba1   :  { %2014 = vadd.xlane.f32.xlu0 %v2013_v27 }
 0xc2a   :  { %v2012_v28 = vpop.xlane.xlu0 %2011 }
 0xc2b   :  { %v2016_v29 = vmul.f32 0.032258064, %v2012_v28 }
 0xc2d   :  { %2447 = vrsqrt.f32 %v2016_v29  ;;  %vm2020_vm2 = vcmp.eq.f32.partialorder %v2016_v29, inf  ;;  %v2023_v33 = vand.u32 2147483648, %v2016_v29  ;;  %vm2022_vm3 = vcmp.eq.f32.partialorder %v2016_v29, 0.0 }
 0xc2e   :  { %v2015_v30 = vpop.xlane.xlu0 %2014 }
 0xc2f   :  { %v2017_v6 = vmul.f32 0.032258064, %v2015_v30 }
 0xc31   :  { %2449 = vrsqrt.f32 %v2017_v6  ;;  %vm2027_vm4 = vcmp.eq.f32.partialorder %v2017_v6, inf  ;;  %v2030_v38 = vand.u32 2147483648, %v2017_v6  ;;  %vm2029_vm5 = vcmp.eq.f32.partialorder %v2017_v6, 0.0 }
 0xc37   :  { %v2448_v31 = vpop.eup %2447 }
 0xc38   :  { %v2019_v32 = vmul.f32 %v2448_v31, %v2016_v29 }
 0xc3a   :  { %v2021_v34 = vsel %vm2020_vm2, %v2016_v29, %v2019_v32 }
 0xc3b   :  { %v2450_v49 = vpop.eup %2449  ;;  %v2024_v35 = vsel %vm2022_vm3, %v2023_v33, %v2021_v34 }
 0xc3c   :  { %v2026_v36 = vmul.f32 %v2450_v49, %v2017_v6  ;;  %v2032_v37 = vadd.f32 1e-06, %v2024_v35 }
 0xc3e   :  { %v2028_v39 = vsel %vm2027_vm4, %v2017_v6, %v2026_v36  ;;  %2451 = vrcp.f32 %v2032_v37 }
 0xc3f   :  { %v2031_v58 = vsel %vm2029_vm5, %v2030_v38, %v2028_v39 }
 0xc40   :  { %v2033_v40 = vadd.f32 1e-06, %v2031_v58 }
 0xc42   :  { %2453 = vrcp.f32 %v2033_v40 }
 0xc48   :  { %v2452_v41 = vpop.eup %2451 }
 0xc49   :  { %v2038_v42 = vmul.f32 %v2452_v41, %v2006_v1 }
 0xc4b   :  { %v2044_v44 = vmul.f32 %v2135_v19, %v2038_v42 }
 0xc4c   :  { %v2454_v45 = vpop.eup %2453 }
 0xc4d   :  { %v2039_v46 = vmul.f32 %v2454_v45, %v2007_v24  ;;  %v2050_v47 = vadd.f32 %v2048_v43, %v2044_v44 }
 0xc4f   :  { %v2045_v48 = vmul.f32 %v2135_v19, %v2039_v46  ;;  %2052 = vst.msk [vmem:[#allocation8] sm:$0xff] %vm135_vm1, %v2050_v47 }
 0xc51   :  { %v2051_v50 = vadd.f32 %v2048_v43, %v2045_v48 }
 0xc53   :  { %2053 = vst.msk [vmem:[#allocation8 + $0x8] sm:$0xff] %vm135_vm1, %v2051_v50 }
 0xc54   :  { %2500 = shalt.err (!%p2497_p3)
}
 0xc55   :  { %s2501_s21 = scalar_lea.hbm %s2911_s4, 256 }
 0xc56   :  { %p2502_p4 = scmp.ne.s32.totalorder %s2911_s4, %s2501_s21  ;;  %p2505_p5 = scmp.lt.u32.totalorder %s2501_s21, %s2911_s4 }
 0xc58   :  { %p2507_p6 = pnand %p2505_p5, %p2502_p4 }
 0xc5a   :  { %2510 = shalt.err (!%p2507_p6)
}
 0xc5b   :  { %2065 = dma.vmem_to_hbm [thread:$0]  %s2060_s9, 256, %s2911_s4, [#allocation5], %s2519_s29, %s2519_s29, %s2520_s30  }
 0xc5c   :  { %2515 = dma.done.wait [#allocation5], 256  }
 0xc5d   :  { %2516 = vsyncadd [#allocation5], 4294967040 }
 0xc5e   :  { %2069 = vsyncpa [#allocation4], 1 }
 0xc5f   :  { %2070 = vsyncpa [#allocation5], 1 }
 0xc60   :  { %2071 = vsyncpa [#allocation6], 1 }

</bundles_post_ra>
